<compile_context>
chip_gen: v6e
topology: v6e:2x2x1
jax: 0.10.0
libtpu: 0.0.40
codegen_flags: <defaults>
</compile_context>

<pallas_src>
import jax
import jax.numpy as jnp
from jax import lax
from jax.experimental import pallas as pl
from jax.experimental.pallas import tpu as pltpu

L = 8            # sequence length seen by the convs (fc1 expects 32 * 8)
C1, C2 = 16, 32  # conv channel counts
H1, H2 = 128, 64
EPS = 1e-5


def _deadlift_kernel(x_ref, w1_ref, b1_ref, w2_ref, b2_ref,
                     wf1_ref, bf1_ref, wf2_ref, bf2_ref, wf3_ref, bf3_ref,
                     out_ref):
    f32 = jnp.float32
    bf16 = jnp.bfloat16

    # conv1 + bn1 + relu on the VPU: K=8 would underfill the 256-deep MXU,
    # so do it as 8 broadcast FMAs over the banded (128, 8) weight (exact f32).
    h1 = w1_ref[:, 0:1] * x_ref[0:1, :]                       # (128, tb)
    for j in range(1, L):
        h1 = h1 + w1_ref[:, j:j + 1] * x_ref[j:j + 1, :]
    h1 = jnp.maximum(h1 + b1_ref[...], 0.0)

    # conv2 + bn2 + relu  (banded bf16 weight, f32 accumulate, f32 bias/ReLU)
    h2 = jnp.dot(w2_ref[...], h1.astype(bf16), preferred_element_type=f32)
    h2 = jnp.maximum(h2 + b2_ref[...], 0.0)                   # (256, tb)

    # fc1 (rows pre-permuted: torch flatten c*8+l -> sublane l*32+c)
    z1 = jnp.dot(wf1_ref[...], h2.astype(bf16), preferred_element_type=f32)
    z1 = jnp.maximum(z1 + bf1_ref[...], 0.0)                  # (128, tb)

    # fc2
    z2 = jnp.dot(wf2_ref[...], z1.astype(bf16), preferred_element_type=f32)
    z2 = jnp.maximum(z2 + bf2_ref[...], 0.0)                  # (64, tb)

    # fc3: single useful output row -> broadcast-multiply + sublane reduce
    # (XLU), no MXU call, no padded store.
    out_ref[...] = (jnp.sum(z2 * wf3_ref[...], axis=0, keepdims=True)
                    + bf3_ref[...])                           # (1, tb)


def _round_up(v, m):
    return ((v + m - 1) // m) * m


def deadlift_forward(x, kparams, *, tb=4096):
    """x: (B, 8) float32 -> (B, 1) float32."""
    B = x.shape[0]
    assert x.shape == (B, L)
    xt = x.astype(jnp.float32).T                     # (8, B): batch on lanes

    # Lane tile: multiple of 128; keep >=2 grid tiles when the batch allows
    # (v7x has 2 TensorCores); cap so the v7x 64 MiB VMEM budget is safe.
    tb = max(128, min(int(tb), 8192))
    tb = min(tb, _round_up(-(-B // 2), 128))
    tb = _round_up(tb, 128)
    Bp = _round_up(B, tb)
    if Bp != B:
        xt = jnp.pad(xt, ((0, 0), (0, Bp - B)))
    grid = (Bp // tb,)

    ins = (xt,) + tuple(kparams)
    in_specs = [pl.BlockSpec((L, tb), lambda i: (0, i))]
    for p in kparams:                    # weights/biases: one constant block
        in_specs.append(pl.BlockSpec(p.shape, lambda i: (0, 0)))

    weight_bytes = sum(int(p.size) * p.dtype.itemsize for p in kparams)
    flops = 2 * Bp * (L * (L * C1) + (L * C1) * (L * C2)
                      + (L * C2) * H1 + H1 * H2 + H2 * 1)
    bytes_accessed = Bp * (L + 1) * 4 + weight_bytes

    # Explicit VMEM budget: double-buffered in/out blocks + weights + f32/bf16
    # intermediates per lane column + compiler scratch headroom.
    interm_per_col = L * C1 * 6 + L * C2 * 6 + H1 * 6 + H2 * 4 + 8
    vmem_limit = int(2 * (L + 1) * tb * 4 + 2 * weight_bytes
                     + tb * interm_per_col + (8 << 20))
    vmem_limit = min(vmem_limit, 56 << 20)

    out = pl.pallas_call(
        _deadlift_kernel,
        out_shape=jax.ShapeDtypeStruct((1, Bp), jnp.float32),
        grid_spec=pltpu.PrefetchScalarGridSpec(
            num_scalar_prefetch=0,
            grid=grid,
            in_specs=in_specs,
            out_specs=pl.BlockSpec((1, tb), lambda i: (0, i)),
        ),
        compiler_params=pltpu.CompilerParams(
            dimension_semantics=("parallel",),
            vmem_limit_bytes=vmem_limit),
        cost_estimate=pl.CostEstimate(
            flops=flops, transcendentals=0, bytes_accessed=bytes_accessed),
    )(*ins)
    return out[0, :B][:, None]


def init_torch_style_params(key):
    ks = jax.random.split(key, 18)

    def rnd(k, shape, scale):
        return (jax.random.normal(k, shape) * scale).astype(jnp.float32)

    tp = dict(
        conv1_w=rnd(ks[0], (C1, 1, 3), 0.3), conv1_b=rnd(ks[1], (C1,), 0.1),
        conv2_w=rnd(ks[2], (C2, C1, 3), 0.1), conv2_b=rnd(ks[3], (C2,), 0.1),
        fc1_w=rnd(ks[4], (H1, C2 * L), 0.05), fc1_b=rnd(ks[5], (H1,), 0.05),
        fc2_w=rnd(ks[6], (H2, H1), 0.05), fc2_b=rnd(ks[7], (H2,), 0.05),
        fc3_w=rnd(ks[8], (1, H2), 0.05), fc3_b=rnd(ks[9], (1,), 0.05),
        bn1_g=1.0 + rnd(ks[10], (C1,), 0.1), bn1_b=rnd(ks[11], (C1,), 0.1),
        bn1_m=rnd(ks[12], (C1,), 0.1), bn1_v=jnp.abs(rnd(ks[13], (C1,), 0.2)) + 0.5,
        bn2_g=1.0 + rnd(ks[14], (C2,), 0.1), bn2_b=rnd(ks[15], (C2,), 0.1),
        bn2_m=rnd(ks[16], (C2,), 0.1), bn2_v=jnp.abs(rnd(ks[17], (C2,), 0.2)) + 0.5,
    )
    return tp


def pack_kernel_params(tp):
    """Fold BN(eval) into the convs and bake taps / zero padding / the torch
    channel-major flatten into banded dense matrices, laid out for the
    'features on sublanes, batch on lanes' kernel (host-side, once)."""
    f32, bf16 = jnp.float32, jnp.bfloat16
    s1 = tp['bn1_g'] / jnp.sqrt(tp['bn1_v'] + EPS)                  # (16,)
    t1 = (tp['conv1_b'] - tp['bn1_m']) * s1 + tp['bn1_b']           # (16,)
    s2 = tp['bn2_g'] / jnp.sqrt(tp['bn2_v'] + EPS)                  # (32,)
    t2 = (tp['conv2_b'] - tp['bn2_m']) * s2 + tp['bn2_b']           # (32,)

    # conv1 band: h1[l*16+c, b] = sum_j W1[l*16+c, j] * x[j, b]
    # with W1[l*16+c, j] = conv1_w[c,0,k] * s1[c] where j = l+k-1 (zero else).
    cw1 = tp['conv1_w'][:, 0, :]                                    # (16, 3)
    w1 = jnp.zeros((L * C1, L), f32)
    for l in range(L):
        for k in range(3):
            j = l + k - 1
            if 0 <= j < L:
                w1 = w1.at[l * C1:(l + 1) * C1, j].set(cw1[:, k] * s1)
    b1 = jnp.tile(t1, L).reshape(L * C1, 1)                         # row l*16+c -> t1[c]

    # conv2 band: h2[l*32+c, b] = sum W2[l*32+c, l'*16+c'] * h1[l'*16+c', b]
    # with W2[l*32+c, l'*16+c'] = conv2_w[c, c', k] * s2[c], l' = l+k-1.
    cw2 = tp['conv2_w']                                             # (32, 16, 3)
    w2 = jnp.zeros((L * C2, L * C1), f32)
    for l in range(L):
        for k in range(3):
            lp = l + k - 1
            if 0 <= lp < L:
                blk = cw2[:, :, k] * s2[:, None]                    # (32, 16) [c, c']
                w2 = w2.at[l * C2:(l + 1) * C2, lp * C1:(lp + 1) * C1].set(blk)
    b2 = jnp.tile(t2, L).reshape(L * C2, 1)

    # fc1: torch flatten index c*8+l  ->  our sublane index l*32+c (column permute).
    wf1 = tp['fc1_w'].reshape(H1, C2, L).transpose(0, 2, 1).reshape(H1, L * C2)
    bf1 = tp['fc1_b'].reshape(H1, 1)
    wf2 = tp['fc2_w']                                               # (64, 128) = (out, in)
    bf2 = tp['fc2_b'].reshape(H2, 1)
    wf3 = tp['fc3_w'].reshape(H2, 1)                                # column vector, f32 (VPU/XLU)
    bf3 = tp['fc3_b'].reshape(1, 1)

    # MXU operands in bf16 (f32 accumulation in-kernel); VPU/reduce paths stay f32.
    return (w1, b1, w2.astype(bf16), b2, wf1.astype(bf16), bf1,
            wf2.astype(bf16), bf2, wf3, bf3)


def reference_forward(x, tp):
    """Pure-JAX reference mirroring the PyTorch forward (eval-mode BN)."""
    B = x.shape[0]
    h = x[:, None, :].astype(jnp.float32)                           # (B,1,8) NCL
    for (w, b, g, be, m, v) in (
        (tp['conv1_w'], tp['conv1_b'], tp['bn1_g'], tp['bn1_b'], tp['bn1_m'], tp['bn1_v']),
        (tp['conv2_w'], tp['conv2_b'], tp['bn2_g'], tp['bn2_b'], tp['bn2_m'], tp['bn2_v']),
    ):
        h = lax.conv_general_dilated(h, w, (1,), ((1, 1),),
                                     dimension_numbers=('NCH', 'OIH', 'NCH'))
        h = h + b[None, :, None]
        h = (h - m[None, :, None]) / jnp.sqrt(v + EPS)[None, :, None] \
            * g[None, :, None] + be[None, :, None]
        h = jnp.maximum(h, 0.0)
    h = h.reshape(B, C2 * L)                                        # torch .view: c*8 + l
    h = jnp.maximum(h @ tp['fc1_w'].T + tp['fc1_b'], 0.0)
    h = jnp.maximum(h @ tp['fc2_w'].T + tp['fc2_b'], 0.0)
    return h @ tp['fc3_w'].T + tp['fc3_b']


if __name__ == "__main__":
    key = jax.random.PRNGKey(0)
    kx, kp = jax.random.split(key)
    B = 4
    x = jax.random.normal(kx, (B, L), dtype=jnp.float32)            # module input is (B, 8)
    tp = init_torch_style_params(kp)
    kparams = pack_kernel_params(tp)

    out = deadlift_forward(x, kparams)
    out = jax.block_until_ready(out)

    ref = reference_forward(x, tp)
    assert out.shape == (B, 1)
    # bf16 MXU operands (f32 accumulation) -> slightly looser tolerance vs f32 reference.
    assert jnp.allclose(out, ref, atol=1e-2, rtol=1e-2), (out, ref)
    # TODO(synk): l1_regularization_loss is a training-time scalar over params,
    # not part of the forward pass; it is intentionally not kernelized.
    print("KERNEL_OK")
</pallas_src>

<mosaic_0001>
module attributes {stable_mosaic.version = 11 : i64} {
  func.func @_deadlift_kernel(%arg0: i32, %arg1: memref<8x128xf32, #tpu.memory_space<vmem>>, %arg2: memref<128x8xf32, #tpu.memory_space<vmem>>, %arg3: memref<128x1xf32, #tpu.memory_space<vmem>>, %arg4: memref<256x128xbf16, #tpu.memory_space<vmem>>, %arg5: memref<256x1xf32, #tpu.memory_space<vmem>>, %arg6: memref<128x256xbf16, #tpu.memory_space<vmem>>, %arg7: memref<128x1xf32, #tpu.memory_space<vmem>>, %arg8: memref<64x128xbf16, #tpu.memory_space<vmem>>, %arg9: memref<64x1xf32, #tpu.memory_space<vmem>>, %arg10: memref<64x1xf32, #tpu.memory_space<vmem>>, %arg11: memref<1x1xf32, #tpu.memory_space<vmem>>, %arg12: memref<1x128xf32, #tpu.memory_space<vmem>>) attributes {dimension_semantics = [#tpu.dimension_semantics<parallel>], iteration_bounds = array<i64: 1>, scalar_prefetch = 0 : i64, scratch_operands = 0 : i64, tpu.core_type = #tpu.core_type<tc>, window_params = [{transform_indices = @transform_0, window_bounds = array<i64: 8, 128>}, {pipeline_mode = #tpu.pipeline_mode<synchronous>, transform_indices = @transform_1, window_bounds = array<i64: 128, 8>}, {pipeline_mode = #tpu.pipeline_mode<synchronous>, transform_indices = @transform_2, window_bounds = array<i64: 128, 1>}, {pipeline_mode = #tpu.pipeline_mode<synchronous>, transform_indices = @transform_3, window_bounds = array<i64: 256, 128>}, {pipeline_mode = #tpu.pipeline_mode<synchronous>, transform_indices = @transform_4, window_bounds = array<i64: 256, 1>}, {pipeline_mode = #tpu.pipeline_mode<synchronous>, transform_indices = @transform_5, window_bounds = array<i64: 128, 256>}, {pipeline_mode = #tpu.pipeline_mode<synchronous>, transform_indices = @transform_6, window_bounds = array<i64: 128, 1>}, {pipeline_mode = #tpu.pipeline_mode<synchronous>, transform_indices = @transform_7, window_bounds = array<i64: 64, 128>}, {pipeline_mode = #tpu.pipeline_mode<synchronous>, transform_indices = @transform_8, window_bounds = array<i64: 64, 1>}, {pipeline_mode = #tpu.pipeline_mode<synchronous>, transform_indices = @transform_9, window_bounds = array<i64: 64, 1>}, {pipeline_mode = #tpu.pipeline_mode<synchronous>, transform_indices = @transform_10, window_bounds = array<i64: 1, 1>}, {transform_indices = @transform_11, window_bounds = array<i64: 1, 128>}]} {
    %c0 = arith.constant 0 : index
    %c0_0 = arith.constant 0 : index
    %0 = vector.load %arg2[%c0, %c0_0] : memref<128x8xf32, #tpu.memory_space<vmem>>, vector<128x1xf32>
    %c0_1 = arith.constant 0 : index
    %c0_2 = arith.constant 0 : index
    %1 = vector.load %arg1[%c0_1, %c0_2] : memref<8x128xf32, #tpu.memory_space<vmem>>, vector<1x128xf32>
    %2 = vector.broadcast %0 : vector<128x1xf32> to vector<128x128xf32>
    %3 = vector.broadcast %1 : vector<1x128xf32> to vector<128x128xf32>
    %4 = arith.mulf %2, %3 : vector<128x128xf32>
    %c0_3 = arith.constant 0 : index
    %c1 = arith.constant 1 : index
    %5 = vector.load %arg2[%c0_3, %c1] : memref<128x8xf32, #tpu.memory_space<vmem>>, vector<128x1xf32>
    %c1_4 = arith.constant 1 : index
    %c0_5 = arith.constant 0 : index
    %6 = vector.load %arg1[%c1_4, %c0_5] : memref<8x128xf32, #tpu.memory_space<vmem>>, vector<1x128xf32>
    %7 = vector.broadcast %5 : vector<128x1xf32> to vector<128x128xf32>
    %8 = vector.broadcast %6 : vector<1x128xf32> to vector<128x128xf32>
    %9 = arith.mulf %7, %8 : vector<128x128xf32>
    %10 = arith.addf %4, %9 : vector<128x128xf32>
    %c0_6 = arith.constant 0 : index
    %c2 = arith.constant 2 : index
    %11 = vector.load %arg2[%c0_6, %c2] : memref<128x8xf32, #tpu.memory_space<vmem>>, vector<128x1xf32>
    %c2_7 = arith.constant 2 : index
    %c0_8 = arith.constant 0 : index
    %12 = vector.load %arg1[%c2_7, %c0_8] : memref<8x128xf32, #tpu.memory_space<vmem>>, vector<1x128xf32>
    %13 = vector.broadcast %11 : vector<128x1xf32> to vector<128x128xf32>
    %14 = vector.broadcast %12 : vector<1x128xf32> to vector<128x128xf32>
    %15 = arith.mulf %13, %14 : vector<128x128xf32>
    %16 = arith.addf %10, %15 : vector<128x128xf32>
    %c0_9 = arith.constant 0 : index
    %c3 = arith.constant 3 : index
    %17 = vector.load %arg2[%c0_9, %c3] : memref<128x8xf32, #tpu.memory_space<vmem>>, vector<128x1xf32>
    %c3_10 = arith.constant 3 : index
    %c0_11 = arith.constant 0 : index
    %18 = vector.load %arg1[%c3_10, %c0_11] : memref<8x128xf32, #tpu.memory_space<vmem>>, vector<1x128xf32>
    %19 = vector.broadcast %17 : vector<128x1xf32> to vector<128x128xf32>
    %20 = vector.broadcast %18 : vector<1x128xf32> to vector<128x128xf32>
    %21 = arith.mulf %19, %20 : vector<128x128xf32>
    %22 = arith.addf %16, %21 : vector<128x128xf32>
    %c0_12 = arith.constant 0 : index
    %c4 = arith.constant 4 : index
    %23 = vector.load %arg2[%c0_12, %c4] : memref<128x8xf32, #tpu.memory_space<vmem>>, vector<128x1xf32>
    %c4_13 = arith.constant 4 : index
    %c0_14 = arith.constant 0 : index
    %24 = vector.load %arg1[%c4_13, %c0_14] : memref<8x128xf32, #tpu.memory_space<vmem>>, vector<1x128xf32>
    %25 = vector.broadcast %23 : vector<128x1xf32> to vector<128x128xf32>
    %26 = vector.broadcast %24 : vector<1x128xf32> to vector<128x128xf32>
    %27 = arith.mulf %25, %26 : vector<128x128xf32>
    %28 = arith.addf %22, %27 : vector<128x128xf32>
    %c0_15 = arith.constant 0 : index
    %c5 = arith.constant 5 : index
    %29 = vector.load %arg2[%c0_15, %c5] : memref<128x8xf32, #tpu.memory_space<vmem>>, vector<128x1xf32>
    %c5_16 = arith.constant 5 : index
    %c0_17 = arith.constant 0 : index
    %30 = vector.load %arg1[%c5_16, %c0_17] : memref<8x128xf32, #tpu.memory_space<vmem>>, vector<1x128xf32>
    %31 = vector.broadcast %29 : vector<128x1xf32> to vector<128x128xf32>
    %32 = vector.broadcast %30 : vector<1x128xf32> to vector<128x128xf32>
    %33 = arith.mulf %31, %32 : vector<128x128xf32>
    %34 = arith.addf %28, %33 : vector<128x128xf32>
    %c0_18 = arith.constant 0 : index
    %c6 = arith.constant 6 : index
    %35 = vector.load %arg2[%c0_18, %c6] : memref<128x8xf32, #tpu.memory_space<vmem>>, vector<128x1xf32>
    %c6_19 = arith.constant 6 : index
    %c0_20 = arith.constant 0 : index
    %36 = vector.load %arg1[%c6_19, %c0_20] : memref<8x128xf32, #tpu.memory_space<vmem>>, vector<1x128xf32>
    %37 = vector.broadcast %35 : vector<128x1xf32> to vector<128x128xf32>
    %38 = vector.broadcast %36 : vector<1x128xf32> to vector<128x128xf32>
    %39 = arith.mulf %37, %38 : vector<128x128xf32>
    %40 = arith.addf %34, %39 : vector<128x128xf32>
    %c0_21 = arith.constant 0 : index
    %c7 = arith.constant 7 : index
    %41 = vector.load %arg2[%c0_21, %c7] : memref<128x8xf32, #tpu.memory_space<vmem>>, vector<128x1xf32>
    %c7_22 = arith.constant 7 : index
    %c0_23 = arith.constant 0 : index
    %42 = vector.load %arg1[%c7_22, %c0_23] : memref<8x128xf32, #tpu.memory_space<vmem>>, vector<1x128xf32>
    %43 = vector.broadcast %41 : vector<128x1xf32> to vector<128x128xf32>
    %44 = vector.broadcast %42 : vector<1x128xf32> to vector<128x128xf32>
    %45 = arith.mulf %43, %44 : vector<128x128xf32>
    %46 = arith.addf %40, %45 : vector<128x128xf32>
    %c0_24 = arith.constant 0 : index
    %c0_25 = arith.constant 0 : index
    %47 = vector.load %arg3[%c0_24, %c0_25] : memref<128x1xf32, #tpu.memory_space<vmem>>, vector<128x1xf32>
    %48 = vector.broadcast %47 : vector<128x1xf32> to vector<128x128xf32>
    %49 = arith.addf %46, %48 : vector<128x128xf32>
    %cst = arith.constant 0.000000e+00 : f32
    %50 = vector.broadcast %cst : f32 to vector<128x128xf32>
    %51 = arith.maximumf %49, %50 : vector<128x128xf32>
    %c0_26 = arith.constant 0 : index
    %c0_27 = arith.constant 0 : index
    %52 = vector.load %arg4[%c0_26, %c0_27] : memref<256x128xbf16, #tpu.memory_space<vmem>>, vector<256x128xbf16>
    %53 = arith.truncf %51 : vector<128x128xf32> to vector<128x128xbf16>
    %cst_28 = arith.constant dense<0.000000e+00> : vector<256x128xf32>
    %54 = tpu.matmul %52, %53, %cst_28 {dimension_numbers = #tpu.dot_dimension_numbers<[1], [0], [0], [1], [0, 0, 1, 1], [], []>} : vector<256x128xbf16>, vector<128x128xbf16>, vector<256x128xf32> -> vector<256x128xf32>
    %c0_29 = arith.constant 0 : index
    %c0_30 = arith.constant 0 : index
    %55 = vector.load %arg5[%c0_29, %c0_30] : memref<256x1xf32, #tpu.memory_space<vmem>>, vector<256x1xf32>
    %56 = vector.broadcast %55 : vector<256x1xf32> to vector<256x128xf32>
    %57 = arith.addf %54, %56 : vector<256x128xf32>
    %cst_31 = arith.constant 0.000000e+00 : f32
    %58 = vector.broadcast %cst_31 : f32 to vector<256x128xf32>
    %59 = arith.maximumf %57, %58 : vector<256x128xf32>
    %c0_32 = arith.constant 0 : index
    %c0_33 = arith.constant 0 : index
    %60 = vector.load %arg6[%c0_32, %c0_33] : memref<128x256xbf16, #tpu.memory_space<vmem>>, vector<128x256xbf16>
    %61 = arith.truncf %59 : vector<256x128xf32> to vector<256x128xbf16>
    %cst_34 = arith.constant dense<0.000000e+00> : vector<128x128xf32>
    %62 = tpu.matmul %60, %61, %cst_34 {dimension_numbers = #tpu.dot_dimension_numbers<[1], [0], [0], [1], [0, 0, 1, 1], [], []>} : vector<128x256xbf16>, vector<256x128xbf16>, vector<128x128xf32> -> vector<128x128xf32>
    %c0_35 = arith.constant 0 : index
    %c0_36 = arith.constant 0 : index
    %63 = vector.load %arg7[%c0_35, %c0_36] : memref<128x1xf32, #tpu.memory_space<vmem>>, vector<128x1xf32>
    %64 = vector.broadcast %63 : vector<128x1xf32> to vector<128x128xf32>
    %65 = arith.addf %62, %64 : vector<128x128xf32>
    %cst_37 = arith.constant 0.000000e+00 : f32
    %66 = vector.broadcast %cst_37 : f32 to vector<128x128xf32>
    %67 = arith.maximumf %65, %66 : vector<128x128xf32>
    %c0_38 = arith.constant 0 : index
    %c0_39 = arith.constant 0 : index
    %68 = vector.load %arg8[%c0_38, %c0_39] : memref<64x128xbf16, #tpu.memory_space<vmem>>, vector<64x128xbf16>
    %69 = arith.truncf %67 : vector<128x128xf32> to vector<128x128xbf16>
    %cst_40 = arith.constant dense<0.000000e+00> : vector<64x128xf32>
    %70 = tpu.matmul %68, %69, %cst_40 {dimension_numbers = #tpu.dot_dimension_numbers<[1], [0], [0], [1], [0, 0, 1, 1], [], []>} : vector<64x128xbf16>, vector<128x128xbf16>, vector<64x128xf32> -> vector<64x128xf32>
    %c0_41 = arith.constant 0 : index
    %c0_42 = arith.constant 0 : index
    %71 = vector.load %arg9[%c0_41, %c0_42] : memref<64x1xf32, #tpu.memory_space<vmem>>, vector<64x1xf32>
    %72 = vector.broadcast %71 : vector<64x1xf32> to vector<64x128xf32>
    %73 = arith.addf %70, %72 : vector<64x128xf32>
    %cst_43 = arith.constant 0.000000e+00 : f32
    %74 = vector.broadcast %cst_43 : f32 to vector<64x128xf32>
    %75 = arith.maximumf %73, %74 : vector<64x128xf32>
    %c0_44 = arith.constant 0 : index
    %c0_45 = arith.constant 0 : index
    %76 = vector.load %arg10[%c0_44, %c0_45] : memref<64x1xf32, #tpu.memory_space<vmem>>, vector<64x1xf32>
    %77 = vector.broadcast %76 : vector<64x1xf32> to vector<64x128xf32>
    %78 = arith.mulf %75, %77 : vector<64x128xf32>
    %cst_46 = arith.constant dense<0.000000e+00> : vector<128xf32>
    %79 = vector.multi_reduction <add>, %78, %cst_46 [0] : vector<64x128xf32> to vector<128xf32>
    %80 = vector.shape_cast %79 : vector<128xf32> to vector<1x128xf32>
    %c0_47 = arith.constant 0 : index
    %c0_48 = arith.constant 0 : index
    %81 = vector.load %arg11[%c0_47, %c0_48] : memref<1x1xf32, #tpu.memory_space<vmem>>, vector<1x1xf32>
    %82 = vector.broadcast %81 : vector<1x1xf32> to vector<1x128xf32>
    %83 = arith.addf %80, %82 : vector<1x128xf32>
    %c0_49 = arith.constant 0 : index
    %c0_50 = arith.constant 0 : index
    %84 = vector.load %arg12[%c0_49, %c0_50] : memref<1x128xf32, #tpu.memory_space<vmem>>, vector<1x128xf32>
    tpu.vector_store %arg12[%c0_49, %c0_50], %83 {strides = array<i32>} : memref<1x128xf32, #tpu.memory_space<vmem>>, vector<1x128xf32>,
    return
  }
  func.func @transform_0(%arg0: i32) -> (i32, i32) {
    %c0_i32 = arith.constant 0 : i32
    %c0_i32_0 = arith.constant 0 : i32
    return %c0_i32, %arg0 : i32, i32
  }
  func.func @transform_1(%arg0: i32) -> (i32, i32) {
    %c0_i32 = arith.constant 0 : i32
    %c0_i32_0 = arith.constant 0 : i32
    %c0_i32_1 = arith.constant 0 : i32
    return %c0_i32, %c0_i32_0 : i32, i32
  }
  func.func @transform_2(%arg0: i32) -> (i32, i32) {
    %c0_i32 = arith.constant 0 : i32
    %c0_i32_0 = arith.constant 0 : i32
    %c0_i32_1 = arith.constant 0 : i32
    return %c0_i32, %c0_i32_0 : i32, i32
  }
  func.func @transform_3(%arg0: i32) -> (i32, i32) {
    %c0_i32 = arith.constant 0 : i32
    %c0_i32_0 = arith.constant 0 : i32
    %c0_i32_1 = arith.constant 0 : i32
    return %c0_i32, %c0_i32_0 : i32, i32
  }
  func.func @transform_4(%arg0: i32) -> (i32, i32) {
    %c0_i32 = arith.constant 0 : i32
    %c0_i32_0 = arith.constant 0 : i32
    %c0_i32_1 = arith.constant 0 : i32
    return %c0_i32, %c0_i32_0 : i32, i32
  }
  func.func @transform_5(%arg0: i32) -> (i32, i32) {
    %c0_i32 = arith.constant 0 : i32
    %c0_i32_0 = arith.constant 0 : i32
    %c0_i32_1 = arith.constant 0 : i32
    return %c0_i32, %c0_i32_0 : i32, i32
  }
  func.func @transform_6(%arg0: i32) -> (i32, i32) {
    %c0_i32 = arith.constant 0 : i32
    %c0_i32_0 = arith.constant 0 : i32
    %c0_i32_1 = arith.constant 0 : i32
    return %c0_i32, %c0_i32_0 : i32, i32
  }
  func.func @transform_7(%arg0: i32) -> (i32, i32) {
    %c0_i32 = arith.constant 0 : i32
    %c0_i32_0 = arith.constant 0 : i32
    %c0_i32_1 = arith.constant 0 : i32
    return %c0_i32, %c0_i32_0 : i32, i32
  }
  func.func @transform_8(%arg0: i32) -> (i32, i32) {
    %c0_i32 = arith.constant 0 : i32
    %c0_i32_0 = arith.constant 0 : i32
    %c0_i32_1 = arith.constant 0 : i32
    return %c0_i32, %c0_i32_0 : i32, i32
  }
  func.func @transform_9(%arg0: i32) -> (i32, i32) {
    %c0_i32 = arith.constant 0 : i32
    %c0_i32_0 = arith.constant 0 : i32
    %c0_i32_1 = arith.constant 0 : i32
    return %c0_i32, %c0_i32_0 : i32, i32
  }
  func.func @transform_10(%arg0: i32) -> (i32, i32) {
    %c0_i32 = arith.constant 0 : i32
    %c0_i32_0 = arith.constant 0 : i32
    %c0_i32_1 = arith.constant 0 : i32
    return %c0_i32, %c0_i32_0 : i32, i32
  }
  func.func @transform_11(%arg0: i32) -> (i32, i32) {
    %c0_i32 = arith.constant 0 : i32
    %c0_i32_0 = arith.constant 0 : i32
    return %c0_i32, %arg0 : i32, i32
  }
}

</mosaic_0001>

<bundles_post_ra>
// kernel: tpu_custom_call.1
= control target key start
LH: loop header
LB: loop body
LE: loop exit
PB: predicated region body
PF: predicated region fallthrough
CT: control target
= control target key end

     0   :  { %s3874_s0 = inlined_call_operand.vmem [shape: f32[8,128], index: 0, kind: input, shape index: {}]   ;;  %s3875_s1 = inlined_call_operand.vmem [shape: f32[128,8], index: 1, kind: input, shape index: {}]   ;;  %s3876_s2 = inlined_call_operand.vmem [shape: f32[128,1], index: 2, kind: input, shape index: {}]   ;;  %s3877_s3 = inlined_call_operand.vmem [shape: bf16[256,128], index: 3, kind: input, shape index: {}]   ;;  %s3878_s4 = inlined_call_operand.vmem [shape: f32[256,1], index: 4, kind: input, shape index: {}]   ;;  %s3879_s5 = inlined_call_operand.vmem [shape: bf16[128,256], index: 5, kind: input, shape index: {}]   ;;  %s3880_s6 = inlined_call_operand.vmem [shape: f32[128,1], index: 6, kind: input, shape index: {}]   ;;  %s3881_s7 = inlined_call_operand.vmem [shape: bf16[64,128], index: 7, kind: input, shape index: {}]   ;;  %s3882_s8 = inlined_call_operand.vmem [shape: f32[64,1], index: 8, kind: input, shape index: {}]   ;;  %s3883_s9 = inlined_call_operand.vmem [shape: f32[64,1], index: 9, kind: input, shape index: {}]   ;;  %s3884_s10 = inlined_call_operand.<no memory space> [shape: f32[1,1], index: 10, kind: input, shape index: {}]   ;;  %s3885_s11 = inlined_call_operand.hbm [shape: f32[1,128], index: 11, kind: output, shape index: {}]  }
   0x1   :  { %v16_v0 = vstv %s3884_s10 }
   0x2   :  { %17 = vst [vmem:[#allocation2] sm:$0x1] %v16_v0 }
   0x3   :  { %v2556_v1 = vld [vmem:[%s3875_s1 + $0x70] sm:$0xff]  ;;  %v2561_v2 = vld [vmem:[%s3875_s1 + $0x58] sm:$0xff]  ;;  %v3886_v3 = vmov 1   ;;  %v2582_v6 = vld [vmem:[%s3875_s1 + $0x28] sm:$0xff]  ;;  %v3896_v8 = vmov 2   ;;  %v3898_v11 = vmov 0  }
   0x4   :  { %2342 = vset.pattern.permute.xlu0 %v3886_v3  ;;  %2333 = vset.pattern.permute.xlu1 %v3886_v3  ;;  %v2570_v4 = vld [vmem:[%s3875_s1 + $0x78] sm:$0xff]  ;;  %v2595_v9 = vld [vmem:[%s3875_s1 + $0x60] sm:$0xff]  ;;  %v2600_v10 = vld [vmem:[%s3875_s1 + $0x8] sm:$0xff] }
   0x5   :  { %217 = vperm.xlu1 %2333, %v2556_v1   ;;  %205 = vperm.xlu0 %2342, %v2561_v2   ;;  %v2575_v5 = vld [vmem:[%s3875_s1 + $0x38] sm:$0xff]  ;;  %v2610_v12 = vld [vmem:[%s3875_s1 + $0x68] sm:$0xff] }
   0x6   :  { %v2587_v7 = vld [vmem:[%s3875_s1 + $0x18] sm:$0xff] }
   0x9   :  { %221 = vperm.xlu1 %2333, %v2570_v4   ;;  %189 = vperm.xlu0 %2342, %v2575_v5  }
   0xd   :  { %2334 = vset.pattern.permute.xlu1 %v3896_v8  ;;  %181 = vperm.xlu0 %2342, %v2582_v6  }
   0xe   :  { %322 = vperm.xlu1 %2334, %v2570_v4  }
  0x11   :  { %173 = vperm.xlu0 %2342, %v2587_v7  }
  0x12   :  { %2335 = vset.pattern.permute.xlu1 %v3898_v11 }
  0x13   :  { %121 = vperm.xlu1 %2335, %v2595_v9  }
  0x15   :  { %165 = vperm.xlu0 %2342, %v2600_v10  }
  0x17   :  { %2336 = vset.pattern.permute.xlu1 %v3886_v3 }
  0x18   :  { %209 = vperm.xlu1 %2336, %v2595_v9  }
  0x19   :  { %2385 = vset.pattern.permute.xlu0 %v3896_v8 }
  0x1a   :  { %318 = vperm.xlu0 %2385, %v2556_v1  }
  0x1c   :  { %213 = vperm.xlu1 %2336, %v2610_v12  }
  0x1d   :  { %18 = vsyncpa [#allocation4], 0  ;;  %v3888_v13 = vmov 3   ;;  %v2623_v14 = vld [vmem:[%s3875_s1 + $0x40] sm:$0xff]  ;;  %v2631_v15 = vld [vmem:[%s3875_s1 + $0x30] sm:$0xff]  ;;  %v3892_v16 = vmov 4  }
  0x1e   :  { %314 = vperm.xlu0 %2385, %v2610_v12   ;;  %v2639_v17 = vld [vmem:[%s3875_s1 + $0x20] sm:$0xff]  ;;  %v2646_v18 = vld [vmem:[%s3875_s1 + $0x10] sm:$0xff]  ;;  %v3894_v21 = vmov 5   ;;  %v2686_v22 = vld [vmem:[%s3875_s1 + $0x48] sm:$0xff]  ;;  %v3890_v23 = vmov 6   ;;  %v3900_v25 = vmov 7  }
  0x1f   :  { %v2653_v19 = vld [vmem:[%s3875_s1] sm:$0xff]  ;;  %v2660_v20 = vld [vmem:[%s3875_s1 + $0x50] sm:$0xff]  ;;  %v881_v51 = vld [vmem:[%s3876_s2 + $0x78] sm:$0xff] }
  0x20   :  { %2337 = vset.pattern.permute.xlu1 %v3888_v13  ;;  %v872_v24 = vld [vmem:[%s3876_s2 + $0x30] sm:$0xff]  ;;  %v866_v62 = vld [vmem:[%s3876_s2] sm:$0xff] }
  0x21   :  { %423 = vperm.xlu1 %2337, %v2570_v4   ;;  %v880_v48 = vld [vmem:[%s3876_s2 + $0x70] sm:$0xff] }
  0x22   :  { %306 = vperm.xlu0 %2385, %v2561_v2  }
  0x25   :  { %2338 = vset.pattern.permute.xlu1 %v3896_v8 }
  0x26   :  { %310 = vperm.xlu1 %2338, %v2595_v9   ;;  %294 = vperm.xlu0 %2385, %v2623_v14  }
  0x2a   :  { %2339 = vset.pattern.permute.xlu1 %v3892_v16  ;;  %286 = vperm.xlu0 %2385, %v2631_v15  }
  0x2b   :  { %520 = vperm.xlu1 %2339, %v2556_v1  }
  0x2e   :  { %278 = vperm.xlu0 %2385, %v2639_v17  }
  0x2f   :  { %524 = vperm.xlu1 %2339, %v2570_v4  }
  0x32   :  { %270 = vperm.xlu0 %2385, %v2646_v18  }
  0x33   :  { %2340 = vset.pattern.permute.xlu1 %v3898_v11 }
  0x34   :  { %116 = vperm.xlu1 %2340, %v2561_v2  }
  0x36   :  { %262 = vperm.xlu0 %2385, %v2653_v19  }
  0x38   :  { %2341 = vset.pattern.permute.xlu1 %v3886_v3 }
  0x39   :  { %201 = vperm.xlu1 %2341, %v2660_v20  }
  0x3a   :  { %2390 = vset.pattern.permute.xlu0 %v3888_v13 }
  0x3b   :  { %419 = vperm.xlu0 %2390, %v2556_v1  }
  0x3d   :  { %2343 = vset.pattern.permute.xlu1 %v3888_v13 }
  0x3e   :  { %411 = vperm.xlu1 %2343, %v2595_v9  }
  0x3f   :  { %403 = vperm.xlu0 %2390, %v2660_v20  }
  0x42   :  { %415 = vperm.xlu1 %2343, %v2610_v12  }
  0x43   :  { %363 = vperm.xlu0 %2390, %v2653_v19  }
  0x46   :  { %2344 = vset.pattern.permute.xlu1 %v3894_v21 }
  0x47   :  { %625 = vperm.xlu1 %2344, %v2570_v4   ;;  %2394 = vset.pattern.permute.xlu0 %v3898_v11 }
  0x48   :  { %131 = vperm.xlu0 %2394, %v2556_v1  }
  0x4b   :  { %2345 = vset.pattern.permute.xlu1 %v3896_v8 }
  0x4c   :  { %302 = vperm.xlu1 %2345, %v2660_v20   ;;  %136 = vperm.xlu0 %2394, %v2570_v4  }
  0x50   :  { %2346 = vset.pattern.permute.xlu1 %v3892_v16  ;;  %126 = vperm.xlu0 %2394, %v2610_v12  }
  0x51   :  { %512 = vperm.xlu1 %2346, %v2595_v9  }
  0x54   :  { %111 = vperm.xlu0 %2394, %v2660_v20  }
  0x55   :  { %516 = vperm.xlu1 %2346, %v2610_v12  }
  0x58   :  { %106 = vperm.xlu0 %2394, %v2686_v22  }
  0x59   :  { %2347 = vset.pattern.permute.xlu1 %v3890_v23 }
  0x5a   :  { %726 = vperm.xlu1 %2347, %v2570_v4  }
  0x5c   :  { %91 = vperm.xlu0 %2394, %v2631_v15  }
  0x5e   :  { %2348 = vset.pattern.permute.xlu1 %v3898_v11 }
  0x5f   :  { %101 = vperm.xlu1 %2348, %v2623_v14  }
  0x60   :  { %81 = vperm.xlu0 %2394, %v2639_v17  }
  0x63   :  { %2349 = vset.pattern.permute.xlu1 %v3886_v3 }
  0x64   :  { %193 = vperm.xlu1 %2349, %v2623_v14   ;;  %71 = vperm.xlu0 %2394, %v2646_v18  }
  0x68   :  { %197 = vperm.xlu1 %2349, %v2686_v22   ;;  %61 = vperm.xlu0 %2394, %v2653_v19  }
  0x6c   :  { %2350 = vset.pattern.permute.xlu1 %v3888_v13  ;;  %914 = vperm.xlu0 %2394, %v872_v24  }
  0x6d   :  { %407 = vperm.xlu1 %2350, %v2561_v2  }
  0x70   :  { %2398 = vset.pattern.permute.xlu0 %v3892_v16 }
  0x71   :  { %2351 = vset.pattern.permute.xlu1 %v3894_v21  ;;  %508 = vperm.xlu0 %2398, %v2561_v2  }
  0x72   :  { %613 = vperm.xlu1 %2351, %v2595_v9  }
  0x75   :  { %500 = vperm.xlu0 %2398, %v2686_v22  }
  0x76   :  { %2352 = vset.pattern.permute.xlu1 %v3900_v25 }
  0x77   :  { %823 = vperm.xlu1 %2352, %v2556_v1  }
  0x79   :  { %492 = vperm.xlu0 %2398, %v2575_v5  }
  0x7b   :  { %827 = vperm.xlu1 %2352, %v2570_v4  }
  0x7d   :  { %484 = vperm.xlu0 %2398, %v2582_v6  }
  0x7f   :  { %2353 = vset.pattern.permute.xlu1 %v3896_v8 }
  0x80   :  { %v2716_v26 = vpop.permute.xlu1 %217  ;;  %298 = vperm.xlu1 %2353, %v2686_v22   ;;  %v2719_v27 = vpop.permute.xlu0 %205 }
  0x81   :  { %476 = vperm.xlu0 %2398, %v2587_v7  }
  0x84   :  { %v2722_v28 = vpop.permute.xlu1 %221  ;;  %2354 = vset.pattern.permute.xlu1 %v3892_v16  ;;  %v2725_v29 = vpop.permute.xlu0 %189 }
  0x85   :  { %3902 = vst [vmem:[#allocation6_spill] sm:$0xff] %v2725_v29  ;;  %504 = vperm.xlu1 %2354, %v2660_v20   ;;  %468 = vperm.xlu0 %2398, %v2600_v10   ;;  %v1035_v29 = vld [vmem:[%s3878_s4 + $0x8] sm:$0xff] }
  0x88   :  { %v2729_v30 = vpop.permute.xlu0 %181 }
  0x89   :  { %3903 = vst [vmem:[#allocation7_spill] sm:$0xff] %v2729_v30  ;;  %v2731_v31 = vpop.permute.xlu1 %322  ;;  %2355 = vset.pattern.permute.xlu1 %v3890_v23  ;;  %2401 = vset.pattern.permute.xlu0 %v3894_v21 }
  0x8a   :  { %714 = vperm.xlu1 %2355, %v2595_v9   ;;  %621 = vperm.xlu0 %2401, %v2556_v1  }
  0x8c   :  { %v2737_v32 = vpop.permute.xlu0 %173 }
  0x8d   :  { %3904 = vst [vmem:[#allocation8_spill] sm:$0xff] %v2737_v32 }
  0x8e   :  { %v2739_v33 = vpop.permute.xlu1 %121  ;;  %718 = vperm.xlu1 %2355, %v2610_v12   ;;  %617 = vperm.xlu0 %2401, %v2610_v12  }
  0x90   :  { %v2743_v34 = vpop.permute.xlu0 %165 }
  0x91   :  { %3905 = vst [vmem:[#allocation9_spill] sm:$0xff] %v2743_v34  ;;  %v3922_v34 = vmov 0  }
  0x92   :  { %2356 = vset.pattern.permute.xlu1 %v3898_v11  ;;  %605 = vperm.xlu0 %2401, %v2660_v20  }
  0x93   :  { %v2747_v35 = vpop.permute.xlu1 %209  ;;  %96 = vperm.xlu1 %2356, %v2575_v5  }
  0x95   :  { %v2750_v36 = vpop.permute.xlu0 %318 }
  0x96   :  { %597 = vperm.xlu0 %2401, %v2623_v14  }
  0x97   :  { %v2753_v37 = vpop.permute.xlu1 %213  ;;  %2357 = vset.pattern.permute.xlu1 %v3886_v3 }
  0x98   :  { %185 = vperm.xlu1 %2357, %v2631_v15  }
  0x99   :  { %v2757_v38 = vpop.permute.xlu0 %314 }
  0x9a   :  { %589 = vperm.xlu0 %2401, %v2631_v15  }
  0x9c   :  { %v2760_v39 = vpop.permute.xlu1 %423  ;;  %2358 = vset.pattern.permute.xlu1 %v3888_v13 }
  0x9d   :  { %395 = vperm.xlu1 %2358, %v2623_v14   ;;  %v2764_v40 = vpop.permute.xlu0 %306 }
  0x9e   :  { %581 = vperm.xlu0 %2401, %v2639_v17  }
  0xa1   :  { %v2767_v41 = vpop.permute.xlu1 %310  ;;  %399 = vperm.xlu1 %2358, %v2686_v22   ;;  %v2770_v42 = vpop.permute.xlu0 %294 }
  0xa2   :  { %3906 = vst [vmem:[#allocation10_spill] sm:$0xff] %v2770_v42  ;;  %577 = vperm.xlu0 %2401, %v2587_v7   ;;  %v1560_v42 = vld [vmem:[%s3880_s6 + $0x68] sm:$0xff] }
  0xa5   :  { %2359 = vset.pattern.permute.xlu1 %v3894_v21  ;;  %v2774_v43 = vpop.permute.xlu0 %286 }
  0xa6   :  { %3907 = vst [vmem:[#allocation11_spill] sm:$0xff] %v2774_v43  ;;  %v2776_v44 = vpop.permute.xlu1 %520  ;;  %609 = vperm.xlu1 %2359, %v2561_v2   ;;  %565 = vperm.xlu0 %2401, %v2653_v19  }
  0xa9   :  { %v2780_v45 = vpop.permute.xlu0 %278 }
  0xaa   :  { %3908 = vst [vmem:[#allocation12_spill] sm:$0xff] %v2780_v45  ;;  %v2782_v46 = vpop.permute.xlu1 %524  ;;  %2360 = vset.pattern.permute.xlu1 %v3900_v25  ;;  %2403 = vset.pattern.permute.xlu0 %v3890_v23  ;;  %v1041_v45 = vld [vmem:[%s3878_s4 + $0x38] sm:$0xff] }
  0xab   :  { %815 = vperm.xlu1 %2360, %v2595_v9   ;;  %722 = vperm.xlu0 %2403, %v2556_v1   ;;  %v1065_v1 = vld [vmem:[%s3878_s4 + $0xf8] sm:$0xff] }
  0xac   :  { %v1049_v9 = vld [vmem:[%s3878_s4 + $0x78] sm:$0xff] }
  0xad   :  { %v2788_v47 = vpop.permute.xlu0 %270 }
  0xae   :  { %3909 = vst [vmem:[#allocation13_spill] sm:$0xff] %v2788_v47 }
  0xaf   :  { %v2793_v49 = vpop.permute.xlu1 %116  ;;  %2361 = vset.pattern.permute.xlu1 %v3898_v11  ;;  %666 = vperm.xlu0 %2403, %v2653_v19  }
  0xb0   :  { %954 = vperm.xlu1 %2361, %v880_v48   ;;  %v1063_v48 = vld [vmem:[%s3878_s4 + $0xe8] sm:$0xff] }
  0xb1   :  { %v2797_v50 = vpop.permute.xlu0 %262 }
  0xb2   :  { %3910 = vst [vmem:[#allocation14_spill] sm:$0xff] %v2797_v50 }
  0xb3   :  { %2407 = vset.pattern.permute.xlu0 %v3900_v25 }
  0xb4   :  { %v2803_v52 = vpop.permute.xlu1 %201  ;;  %959 = vperm.xlu1 %2361, %v881_v51   ;;  %819 = vperm.xlu0 %2407, %v2610_v12  }
  0xb6   :  { %v2806_v53 = vpop.permute.xlu0 %419 }
  0xb8   :  { %2362 = vset.pattern.permute.xlu1 %v3896_v8  ;;  %811 = vperm.xlu0 %2407, %v2561_v2  }
  0xb9   :  { %v2810_v54 = vpop.permute.xlu1 %411  ;;  %290 = vperm.xlu1 %2362, %v2575_v5  }
  0xba   :  { %v2813_v55 = vpop.permute.xlu0 %403 }
  0xbc   :  { %803 = vperm.xlu0 %2407, %v2686_v22  }
  0xbd   :  { %v2816_v56 = vpop.permute.xlu1 %415  ;;  %2363 = vset.pattern.permute.xlu1 %v3892_v16 }
  0xbe   :  { %496 = vperm.xlu1 %2363, %v2623_v14   ;;  %v2820_v57 = vpop.permute.xlu0 %363 }
  0xbf   :  { %3911 = vst [vmem:[#allocation15_spill] sm:$0xff] %v2820_v57  ;;  %v1039_v57 = vld [vmem:[%s3878_s4 + $0x28] sm:$0xff] }
  0xc0   :  { %795 = vperm.xlu0 %2407, %v2575_v5  }
  0xc2   :  { %v2823_v58 = vpop.permute.xlu1 %625  ;;  %2364 = vset.pattern.permute.xlu1 %v3890_v23  ;;  %v1045_v23 = vld [vmem:[%s3878_s4 + $0x58] sm:$0xff] }
  0xc3   :  { %706 = vperm.xlu1 %2364, %v2660_v20   ;;  %v2827_v59 = vpop.permute.xlu0 %131 }
  0xc4   :  { %779 = vperm.xlu0 %2407, %v2587_v7  }
  0xc7   :  { %v2830_v60 = vpop.permute.xlu1 %302  ;;  %710 = vperm.xlu1 %2364, %v2561_v2   ;;  %v2833_v61 = vpop.permute.xlu0 %136 }
  0xc8   :  { %771 = vperm.xlu0 %2407, %v2600_v10  }
  0xcb   :  { %2365 = vset.pattern.permute.xlu1 %v3898_v11  ;;  %v2840_v63 = vpop.permute.xlu0 %126 }
  0xcc   :  { %v2842_v0 = vpop.permute.xlu1 %512  ;;  %86 = vperm.xlu1 %2365, %v2582_v6   ;;  %2411 = vset.pattern.permute.xlu0 %v3898_v11 }
  0xcd   :  { %884 = vperm.xlu0 %2411, %v866_v62  }
  0xcf   :  { %v2849_v2 = vpop.permute.xlu0 %111 }
  0xd0   :  { %v2851_v4 = vpop.permute.xlu1 %516  ;;  %2366 = vset.pattern.permute.xlu1 %v3886_v3 }
  0xd1   :  { %177 = vperm.xlu1 %2366, %v2639_v17   ;;  %1223 = vperm.xlu0 %2411, %v1065_v1   ;;  %v1047_v1 = vld [vmem:[%s3878_s4 + $0x68] sm:$0xff] }
  0xd3   :  { %v2858_v12 = vpop.permute.xlu0 %106 }
  0xd4   :  { %3912 = vst [vmem:[#allocation16_spill] sm:$0xff] %v2858_v12 }
  0xd5   :  { %v2860_v24 = vpop.permute.xlu1 %726  ;;  %2367 = vset.pattern.permute.xlu1 %v3888_v13  ;;  %1143 = vperm.xlu0 %2411, %v1049_v9   ;;  %v1061_v9 = vld [vmem:[%s3878_s4 + $0xd8] sm:$0xff] }
  0xd6   :  { %387 = vperm.xlu1 %2367, %v2631_v15  }
  0xd7   :  { %v2867_v51 = vpop.permute.xlu0 %91 }
  0xd8   :  { %3913 = vst [vmem:[#allocation17_spill] sm:$0xff] %v2867_v51 }
  0xd9   :  { %1213 = vperm.xlu0 %2411, %v1063_v48  }
  0xda   :  { %v2869_v62 = vpop.permute.xlu1 %101  ;;  %391 = vperm.xlu1 %2367, %v2575_v5  }
  0xdb   :  { %3914 = vst [vmem:[#allocation18_spill] sm:$0xff] %v2869_v62  ;;  %v2875_v3 = vpop.permute.xlu0 %81  ;;  %v1558_v62 = vld [vmem:[%s3880_s6 + $0x58] sm:$0xff] }
  0xdc   :  { %3915 = vst [vmem:[#allocation19_spill] sm:$0xff] %v2875_v3  ;;  %v1055_v3 = vld [vmem:[%s3878_s4 + $0xa8] sm:$0xff] }
  0xdd   :  { %1133 = vperm.xlu0 %2411, %v1047_v1  }
  0xde   :  { %2368 = vset.pattern.permute.xlu1 %v3894_v21  ;;  %v878_v21 = vld [vmem:[%s3876_s2 + $0x60] sm:$0xff] }
  0xdf   :  { %v2881_v13 = vpop.permute.xlu1 %193  ;;  %601 = vperm.xlu1 %2368, %v2686_v22   ;;  %v2884_v48 = vpop.permute.xlu0 %71 }
  0xe0   :  { %3916 = vst [vmem:[#allocation20_spill] sm:$0xff] %v2881_v13  ;;  %3917 = vst [vmem:[#allocation21_spill] sm:$0xff] %v2884_v48  ;;  %v1057_v48 = vld [vmem:[%s3878_s4 + $0xb8] sm:$0xff]  ;;  %v3941_v13 = vmov 5  }
  0xe1   :  { %1203 = vperm.xlu0 %2411, %v1061_v9   ;;  %v1059_v9 = vld [vmem:[%s3878_s4 + $0xc8] sm:$0xff] }
  0xe3   :  { %v2889_v16 = vpop.permute.xlu1 %197  ;;  %2369 = vset.pattern.permute.xlu1 %v3900_v25  ;;  %v2892_v1 = vpop.permute.xlu0 %61 }
  0xe4   :  { %3918 = vst [vmem:[#allocation22_spill] sm:$0xff] %v2889_v16  ;;  %3919 = vst [vmem:[#allocation23_spill] sm:$0xff] %v2892_v1  ;;  %807 = vperm.xlu1 %2369, %v2660_v20   ;;  %v879_v20 = vld [vmem:[%s3876_s2 + $0x68] sm:$0xff]  ;;  %v1053_v1 = vld [vmem:[%s3878_s4 + $0x98] sm:$0xff] }
  0xe5   :  { %1123 = vperm.xlu0 %2411, %v1045_v23   ;;  %v1043_v23 = vld [vmem:[%s3878_s4 + $0x48] sm:$0xff] }
  0xe7   :  { %v2901_v8 = vpop.permute.xlu0 %914 }
  0xe8   :  { %3920 = vst [vmem:[#allocation24_spill] sm:$0xff] %v2901_v8  ;;  %v2903_v11 = vpop.permute.xlu1 %407  ;;  %2370 = vset.pattern.permute.xlu1 %v3922_v34 }
  0xe9   :  { %3921 = vst [vmem:[#allocation25_spill] sm:$0xff] %v2903_v11  ;;  %944 = vperm.xlu1 %2370, %v878_v21   ;;  %1193 = vperm.xlu0 %2411, %v1059_v9   ;;  %v3925_v9 = vmov 2  }
  0xec   :  { %v2912_v25 = vpop.permute.xlu0 %508 }
  0xed   :  { %3923 = vst [vmem:[#allocation26_spill] sm:$0xff] %v2912_v25  ;;  %v2914_v47 = vpop.permute.xlu1 %613  ;;  %949 = vperm.xlu1 %2370, %v879_v20   ;;  %1113 = vperm.xlu0 %2411, %v1043_v23   ;;  %v3927_v23 = vmov 4  }
  0xf0   :  { %v2919_v21 = vpop.permute.xlu0 %500 }
  0xf1   :  { %3924 = vst [vmem:[#allocation27_spill] sm:$0xff] %v2919_v21  ;;  %2371 = vset.pattern.permute.xlu1 %v3925_v9  ;;  %1183 = vperm.xlu0 %2411, %v1057_v48   ;;  %v3937_v21 = vmov 3  }
  0xf2   :  { %v2922_v32 = vpop.permute.xlu1 %823  ;;  %282 = vperm.xlu1 %2371, %v2582_v6  }
  0xf4   :  { %v2928_v30 = vpop.permute.xlu0 %492 }
  0xf5   :  { %3926 = vst [vmem:[#allocation28_spill] sm:$0xff] %v2928_v30  ;;  %1103 = vperm.xlu0 %2411, %v1041_v45   ;;  %v3930_v45 = vmov 6  }
  0xf6   :  { %v2930_v20 = vpop.permute.xlu1 %827  ;;  %2372 = vset.pattern.permute.xlu1 %v3927_v23 }
  0xf7   :  { %488 = vperm.xlu1 %2372, %v2631_v15  }
  0xf8   :  { %v2937_v48 = vpop.permute.xlu0 %484 }
  0xf9   :  { %3928 = vst [vmem:[#allocation29_spill] sm:$0xff] %v2937_v48  ;;  %1173 = vperm.xlu0 %2411, %v1055_v3   ;;  %v1037_v48 = vld [vmem:[%s3878_s4 + $0x18] sm:$0xff] }
  0xfb   :  { %v2942_v50 = vpop.permute.xlu1 %298  ;;  %2373 = vset.pattern.permute.xlu1 %v3930_v45 }
  0xfc   :  { %3929 = vst [vmem:[#allocation30_spill] sm:$0xff] %v2942_v50  ;;  %698 = vperm.xlu1 %2373, %v2623_v14   ;;  %v2946_v8 = vpop.permute.xlu0 %476  ;;  %v1562_v50 = vld [vmem:[%s3880_s6 + $0x78] sm:$0xff] }
  0xfd   :  { %3931 = vst [vmem:[#allocation31_spill] sm:$0xff] %v2946_v8  ;;  %1093 = vperm.xlu0 %2411, %v1039_v57  }
 0x100   :  { %v2951_v30 = vpop.permute.xlu1 %504  ;;  %702 = vperm.xlu1 %2373, %v2686_v22   ;;  %v2954_v3 = vpop.permute.xlu0 %468  ;;  %v1051_v22 = vld [vmem:[%s3878_s4 + $0x88] sm:$0xff] }
 0x101   :  { %3932 = vst [vmem:[#allocation32_spill] sm:$0xff] %v2951_v30  ;;  %3933 = vst [vmem:[#allocation33_spill] sm:$0xff] %v2954_v3  ;;  %1163 = vperm.xlu0 %2411, %v1053_v1   ;;  %v3934_v1 = vmov 1  }
 0x104   :  { %2374 = vset.pattern.permute.xlu1 %v3922_v34 }
 0x105   :  { %v2960_v43 = vpop.permute.xlu1 %714  ;;  %76 = vperm.xlu1 %2374, %v2587_v7   ;;  %v2963_v57 = vpop.permute.xlu0 %621  ;;  %1083 = vperm.xlu0 %2411, %v1037_v48  }
 0x109   :  { %v2968_v8 = vpop.permute.xlu1 %718  ;;  %2375 = vset.pattern.permute.xlu1 %v3934_v1  ;;  %v2971_v3 = vpop.permute.xlu0 %617  ;;  %1153 = vperm.xlu0 %2411, %v1051_v22  }
 0x10a   :  { %169 = vperm.xlu1 %2375, %v2646_v18  }
 0x10d   :  { %v2977_v51 = vpop.permute.xlu0 %605  ;;  %1073 = vperm.xlu0 %2411, %v1035_v29   ;;  %v2997_v29 = vld [vmem:[%s3874_s0 + $0x1] ss:$0 sm:$0xff] }
 0x10e   :  { %3935 = vst [vmem:[#allocation34_spill] sm:$0xff] %v2977_v51  ;;  %v2979_v48 = vpop.permute.xlu1 %96  ;;  %2376 = vset.pattern.permute.xlu1 %v3937_v21  ;;  %v242_v12 = vmul.f32 %v2997_v29, %v2716_v26  ;;  %v243_v51 = vmul.f32 %v2997_v29, %v2722_v28  ;;  %v1556_v28 = vld [vmem:[%s3880_s6 + $0x48] sm:$0xff] }
 0x10f   :  { %3936 = vst [vmem:[#allocation35_spill] sm:$0xff] %v2979_v48  ;;  %379 = vperm.xlu1 %2376, %v2639_v17   ;;  %v3002_v48 = vld [vmem:[%s3874_s0] ss:$0 sm:$0xff] }
 0x111   :  { %v2986_v22 = vpop.permute.xlu0 %597  ;;  %1640 = vperm.xlu0 %2411, %v1562_v50   ;;  %v157_v50 = vmul.f32 %v3002_v48, %v2827_v59  ;;  %v3021_v59 = vld [vmem:[%s3874_s0 + $0x2] ss:$0 sm:$0xff] }
 0x112   :  { %3938 = vst [vmem:[#allocation36_spill] sm:$0xff] %v2986_v22  ;;  %v344_v25 = vmul.f32 %v3021_v59, %v2731_v31  ;;  %v1554_v31 = vld [vmem:[%s3880_s6 + $0x38] sm:$0xff] }
 0x113   :  { %v2991_v16 = vpop.permute.xlu1 %185  ;;  %383 = vperm.xlu1 %2376, %v2582_v6  }
 0x114   :  { %3939 = vst [vmem:[#allocation37_spill] sm:$0xff] %v2991_v16  ;;  %v158_v16 = vmul.f32 %v3002_v48, %v2833_v61  ;;  %v343_v61 = vmul.f32 %v3021_v59, %v2750_v36  ;;  %v3945_v36 = vmov 7  }
 0x115   :  { %v3006_v22 = vpop.permute.xlu0 %589  ;;  %1630 = vperm.xlu0 %2411, %v1560_v42  }
 0x116   :  { %3940 = vst [vmem:[#allocation38_spill] sm:$0xff] %v3006_v22  ;;  %v258_v22 = vadd.f32 %v242_v12, %v157_v50  ;;  %v259_v26 = vadd.f32 %v243_v51, %v158_v16  ;;  %v876_v50 = vld [vmem:[%s3876_s2 + $0x50] sm:$0xff] }
 0x117   :  { %2377 = vset.pattern.permute.xlu1 %v3941_v13 }
 0x118   :  { %v3023_v42 = vpop.permute.xlu1 %395  ;;  %593 = vperm.xlu1 %2377, %v2575_v5   ;;  %v359_v16 = vadd.f32 %v343_v61, %v258_v22  ;;  %v3069_v61 = vld [vmem:[%s3874_s0 + $0x5] ss:$0 sm:$0xff] }
 0x119   :  { %3942 = vst [vmem:[#allocation39_spill] sm:$0xff] %v3023_v42  ;;  %v3028_v30 = vpop.permute.xlu0 %581  ;;  %1620 = vperm.xlu0 %2411, %v1558_v62   ;;  %v3038_v42 = vld [vmem:[%s3874_s0 + $0x3] ss:$0 sm:$0xff]  ;;  %v360_v62 = vadd.f32 %v344_v25, %v259_v26 }
 0x11a   :  { %3943 = vst [vmem:[#allocation40_spill] sm:$0xff] %v3028_v30  ;;  %v444_v12 = vmul.f32 %v3038_v42, %v2806_v53  ;;  %v445_v30 = vmul.f32 %v3038_v42, %v2760_v39  ;;  %v3059_v53 = vld [vmem:[%s3874_s0 + $0x4] ss:$0 sm:$0xff]  ;;  %v1552_v39 = vld [vmem:[%s3880_s6 + $0x28] sm:$0xff] }
 0x11c   :  { %v3040_v11 = vpop.permute.xlu1 %399  ;;  %2378 = vset.pattern.permute.xlu1 %v3945_v36  ;;  %v461_v26 = vadd.f32 %v445_v30, %v360_v62  ;;  %v3086_v30 = vld [vmem:[%s3874_s0 + $0x6] ss:$0 sm:$0xff] }
 0x11d   :  { %3944 = vst [vmem:[#allocation41_spill] sm:$0xff] %v3040_v11  ;;  %799 = vperm.xlu1 %2378, %v2623_v14   ;;  %v3046_v51 = vpop.permute.xlu0 %577  ;;  %1610 = vperm.xlu0 %2411, %v1556_v28   ;;  %v460_v14 = vadd.f32 %v444_v12, %v359_v16  ;;  %v545_v28 = vmul.f32 %v3059_v53, %v2776_v44  ;;  %v877_v16 = vld [vmem:[%s3876_s2 + $0x58] sm:$0xff]  ;;  %v3091_v44 = vld [vmem:[%s3874_s0 + $0x7] ss:$0 sm:$0xff] }
 0x11e   :  { %3946 = vst [vmem:[#allocation42_spill] sm:$0xff] %v3046_v51  ;;  %v646_v12 = vmul.f32 %v3069_v61, %v2963_v57 }
 0x11f   :  { %v561_v62 = vadd.f32 %v545_v28, %v460_v14  ;;  %v647_v14 = vmul.f32 %v3069_v61, %v2823_v58 }
 0x121   :  { %v3061_v22 = vpop.permute.xlu1 %609  ;;  %2379 = vset.pattern.permute.xlu1 %v3922_v34  ;;  %v3064_v25 = vpop.permute.xlu0 %565  ;;  %1600 = vperm.xlu0 %2411, %v1554_v31   ;;  %v546_v31 = vmul.f32 %v3059_v53, %v2782_v46  ;;  %v1550_v46 = vld [vmem:[%s3880_s6 + $0x18] sm:$0xff] }
 0x122   :  { %3947 = vst [vmem:[#allocation43_spill] sm:$0xff] %v3064_v25  ;;  %934 = vperm.xlu1 %2379, %v876_v50   ;;  %v662_v25 = vadd.f32 %v646_v12, %v561_v62 }
 0x123   :  { %v562_v50 = vadd.f32 %v546_v31, %v461_v26  ;;  %v748_v26 = vmul.f32 %v3086_v30, %v2860_v24  ;;  %v849_v31 = vmul.f32 %v3091_v44, %v2930_v20 }
 0x125   :  { %1590 = vperm.xlu0 %2411, %v1552_v39   ;;  %v848_v39 = vmul.f32 %v3091_v44, %v2922_v32 }
 0x126   :  { %v3093_v57 = vpop.permute.xlu1 %815  ;;  %939 = vperm.xlu1 %2379, %v877_v16   ;;  %v723_v51 = vpop.permute.xlu0 %722  ;;  %v663_v16 = vadd.f32 %v647_v14, %v562_v50  ;;  %v1855_v14 = vld [vmem:[%s3882_s8 + $0x18] sm:$0xff] }
 0x127   :  { %v747_v11 = vmul.f32 %v3086_v30, %v723_v51  ;;  %v1548_v51 = vld [vmem:[%s3880_s6 + $0x8] sm:$0xff] }
 0x128   :  { %v764_v24 = vadd.f32 %v748_v26, %v663_v16 }
 0x129   :  { %v763_v28 = vadd.f32 %v747_v11, %v662_v25  ;;  %1580 = vperm.xlu0 %2411, %v1550_v46   ;;  %v1853_v11 = vld [vmem:[%s3882_s8 + $0x8] sm:$0xff] }
 0x12a   :  { %2380 = vset.pattern.permute.xlu1 %v3925_v9  ;;  %v865_v32 = vadd.f32 %v849_v31, %v764_v24  ;;  %v1999_v31 = vld [vmem:[%s3883_s9 + $0x10] sm:$0xff]  ;;  %v2002_v24 = vld [vmem:[%s3883_s9 + $0x28] sm:$0xff] }
 0x12b   :  { %v955_v12 = vpop.permute.xlu1 %954  ;;  %v864_v58 = vadd.f32 %v848_v39, %v763_v28  ;;  %274 = vperm.xlu1 %2380, %v2587_v7   ;;  %v1998_v28 = vld [vmem:[%s3883_s9 + $0x8] sm:$0xff] }
 0x12d   :  { %1570 = vperm.xlu0 %2411, %v1548_v51   ;;  %v976_v62 = vadd.f32 %v955_v12, %v864_v58  ;;  %v2000_v12 = vld [vmem:[%s3883_s9 + $0x18] sm:$0xff] }
 0x12f   :  { %v960_v25 = vpop.permute.xlu1 %959  ;;  %2381 = vset.pattern.permute.xlu1 %v3927_v23  ;;  %v992_v50 = vmax.f32 %v976_v62, 0.0 }
 0x130   :  { %v977_v20 = vadd.f32 %v960_v25, %v865_v32  ;;  %480 = vperm.xlu1 %2381, %v2639_v17   ;;  %v241_v25 = vmul.f32 %v2997_v29, %v2753_v37  ;;  %v155_v37 = vmul.f32 %v3002_v48, %v2739_v33 }
 0x131   :  { %1867 = vperm.xlu0 %2411, %v1853_v11   ;;  %v156_v11 = vmul.f32 %v3002_v48, %v2840_v63  ;;  %v341_v63 = vmul.f32 %v3021_v59, %v2767_v41  ;;  %v543_v41 = vmul.f32 %v3059_v53, %v2842_v0  ;;  %v745_v0 = vmul.f32 %v3086_v30, %v2960_v43 }
 0x132   :  { %v993_v46 = vmax.f32 %v977_v20, 0.0 }
 0x134   :  { %v3120_v26 = vpop.permute.xlu1 %290  ;;  %2382 = vset.pattern.permute.xlu1 %v3930_v45  ;;  %v1033_v39 = vpack.c.bf16 %v993_v46, %v992_v50  ;;  %v342_v50 = vmul.f32 %v3021_v59, %v2757_v38  ;;  %v257_v46 = vadd.f32 %v241_v25, %v156_v11  ;;  %v874_v38 = vld [vmem:[%s3876_s2 + $0x40] sm:$0xff]  ;;  %v645_v11 = vmul.f32 %v3069_v61, %v2971_v3 }
 0x135   :  { %690 = vperm.xlu1 %2382, %v2631_v15   ;;  %1877 = vperm.xlu0 %2411, %v1855_v14  }
 0x136   :  { %2236 = vmatprep.subr.bf16.mxu0 %v1033_v39 }
 0x137   :  { %2237 = vmatpush3.bf16.msra.mxu0 %v1033_v39  ;;  %v358_v39 = vadd.f32 %v342_v50, %v257_v46 }
 0x139   :  { %v3127_v16 = vpop.permute.xlu1 %496  ;;  %694 = vperm.xlu1 %2382, %v2575_v5   ;;  %2012 = vperm.xlu0 %2411, %v1998_v28   ;;  %v2001_v5 = vld [vmem:[%s3883_s9 + $0x20] sm:$0xff] }
 0x13d   :  { %2383 = vset.pattern.permute.xlu1 %v3922_v34  ;;  %2017 = vperm.xlu0 %2411, %v1999_v31   ;;  %v443_v31 = vmul.f32 %v3038_v42, %v2816_v56 }
 0x13e   :  { %v3134_v51 = vpop.permute.xlu1 %706  ;;  %66 = vperm.xlu1 %2383, %v2600_v10  }
 0x141   :  { %2022 = vperm.xlu0 %2411, %v2000_v12   ;;  %v3187_v12 = vpop.permute.xlu0 %666 }
 0x142   :  { %v3140_v58 = vpop.permute.xlu1 %710  ;;  %2384 = vset.pattern.permute.xlu1 %v3934_v1  ;;  %v2004_v1 = vld [vmem:[%s3883_s9 + $0x38] sm:$0xff] }
 0x143   :  { %161 = vperm.xlu1 %2384, %v2653_v19  }
 0x145   :  { %2027 = vperm.xlu0 %2411, %v2001_v5   ;;  %v459_v5 = vadd.f32 %v443_v31, %v358_v39 }
 0x147   :  { %v3150_v62 = vpop.permute.xlu1 %86  ;;  %2386 = vset.pattern.permute.xlu1 %v3937_v21 }
 0x148   :  { %371 = vperm.xlu1 %2386, %v2646_v18  }
 0x149   :  { %2032 = vperm.xlu0 %2411, %v2002_v24   ;;  %v544_v24 = vmul.f32 %v3059_v53, %v2851_v4  ;;  %v820_v4 = vpop.permute.xlu0 %819 }
 0x14a   :  { %v847_v3 = vmul.f32 %v3091_v44, %v820_v4 }
 0x14b   :  { %v560_v50 = vadd.f32 %v544_v24, %v459_v5 }
 0x14c   :  { %v3157_v32 = vpop.permute.xlu1 %177  ;;  %375 = vperm.xlu1 %2386, %v2587_v7   ;;  %v240_v7 = vmul.f32 %v2997_v29, %v2747_v35  ;;  %v442_v35 = vmul.f32 %v3038_v42, %v2810_v54  ;;  %v875_v54 = vld [vmem:[%s3876_s2 + $0x48] sm:$0xff] }
 0x14d   :  { %2042 = vperm.xlu0 %2411, %v2004_v1   ;;  %v644_v1 = vmul.f32 %v3069_v61, %v2914_v47  ;;  %v746_v47 = vmul.f32 %v3086_v30, %v2968_v8 }
 0x14e   :  { %v256_v28 = vadd.f32 %v240_v7, %v155_v37  ;;  %v661_v37 = vadd.f32 %v645_v11, %v560_v50  ;;  %v154_v50 = vmul.f32 %v3002_v48, %v2793_v49  ;;  %v440_v49 = vmul.f32 %v3038_v42, %v2813_v55  ;;  %v3951_v55 = vld [vmem:[#allocation34_spill] sm:$0xff] }
 0x150   :  { %2387 = vset.pattern.permute.xlu1 %v3941_v13  ;;  %v357_v33 = vadd.f32 %v341_v63, %v256_v28  ;;  %v846_v63 = vmul.f32 %v3091_v44, %v3093_v57  ;;  %v762_v43 = vadd.f32 %v746_v47, %v661_v37 }
 0x151   :  { %v3165_v20 = vpop.permute.xlu1 %387  ;;  %585 = vperm.xlu1 %2387, %v2582_v6  }
 0x152   :  { %v458_v56 = vadd.f32 %v442_v35, %v357_v33  ;;  %v863_v35 = vadd.f32 %v847_v3, %v762_v43  ;;  %v3949_v3 = vld [vmem:[#allocation26_spill] sm:$0xff] }
 0x154   :  { %v559_v25 = vadd.f32 %v543_v41, %v458_v56 }
 0x155   :  { %v3172_v14 = vpop.permute.xlu1 %391  ;;  %2388 = vset.pattern.permute.xlu1 %v3945_v36 }
 0x156   :  { %791 = vperm.xlu1 %2388, %v2631_v15   ;;  %v660_v7 = vadd.f32 %v644_v1, %v559_v25 }
 0x158   :  { %v761_v39 = vadd.f32 %v745_v0, %v660_v7  ;;  %v238_v0 = vmul.f32 %v2997_v29, %v2803_v52 }
 0x15a   :  { %v3189_v15 = vpop.permute.xlu1 %601  ;;  %2389 = vset.pattern.permute.xlu1 %v3922_v34  ;;  %v862_v28 = vadd.f32 %v846_v63, %v761_v39  ;;  %v3948_v39 = vld [vmem:[#allocation25_spill] sm:$0xff] }
 0x15b   :  { %924 = vperm.xlu1 %2389, %v874_v38   ;;  %v441_v52 = vmul.f32 %v3038_v42, %v3948_v39 }
 0x15f   :  { %v3205_v46 = vpop.permute.xlu1 %807  ;;  %929 = vperm.xlu1 %2389, %v875_v54  }
 0x163   :  { %2391 = vset.pattern.permute.xlu1 %v3925_v9 }
 0x164   :  { %v945_v38 = vpop.permute.xlu1 %944  ;;  %266 = vperm.xlu1 %2391, %v2600_v10  }
 0x165   :  { %v974_v31 = vadd.f32 %v945_v38, %v862_v28  ;;  %v542_v38 = vmul.f32 %v3059_v53, %v3949_v3  ;;  %v871_v3 = vld [vmem:[%s3876_s2 + $0x28] sm:$0xff] }
 0x167   :  { %v990_v57 = vmax.f32 %v974_v31, 0.0  ;;  %v643_v31 = vmul.f32 %v3069_v61, %v3061_v22  ;;  %v844_v22 = vmul.f32 %v3091_v44, %v3205_v46 }
 0x168   :  { %v950_v33 = vpop.permute.xlu1 %949  ;;  %2392 = vset.pattern.permute.xlu1 %v3927_v23 }
 0x169   :  { %v975_v41 = vadd.f32 %v950_v33, %v863_v35  ;;  %472 = vperm.xlu1 %2392, %v2646_v18   ;;  %v642_v35 = vmul.f32 %v3069_v61, %v3951_v55 }
 0x16b   :  { %v991_v5 = vmax.f32 %v975_v41, 0.0 }
 0x16d   :  { %v3216_v8 = vpop.permute.xlu1 %282  ;;  %2393 = vset.pattern.permute.xlu1 %v3930_v45  ;;  %v1032_v9 = vpack.c.bf16 %v991_v5, %v990_v57  ;;  %v743_v57 = vmul.f32 %v3086_v30, %v3134_v51  ;;  %v744_v5 = vmul.f32 %v3086_v30, %v3140_v58 }
 0x16e   :  { %682 = vperm.xlu1 %2393, %v2639_v17  }
 0x16f   :  { %2238 = vmatprep.subr.bf16.mxu0 %v1032_v9 }
 0x170   :  { %2239 = vmatpush3.bf16.msra.mxu0 %v1032_v9 }
 0x172   :  { %v3220_v24 = vpop.permute.xlu1 %488  ;;  %686 = vperm.xlu1 %2393, %v2582_v6   ;;  %v2456_v6 = vld [vmem:[%s3875_s1 + $0x28] sm:$0xff] }
 0x176   :  { %2395 = vset.pattern.permute.xlu1 %v3937_v21  ;;  %v153_v21 = vmul.f32 %v3002_v48, %v2849_v2  ;;  %v340_v2 = vmul.f32 %v3021_v59, %v2764_v40  ;;  %v3950_v40 = vld [vmem:[#allocation32_spill] sm:$0xff] }
 0x177   :  { %v3224_v54 = vpop.permute.xlu1 %698  ;;  %367 = vperm.xlu1 %2395, %v2600_v10   ;;  %v873_v10 = vld [vmem:[%s3876_s2 + $0x38] sm:$0xff]  ;;  %v541_v43 = vmul.f32 %v3059_v53, %v3950_v40 }
 0x178   :  { %v254_v4 = vadd.f32 %v238_v0, %v153_v21 }
 0x17b   :  { %v3227_v56 = vpop.permute.xlu1 %702  ;;  %2396 = vset.pattern.permute.xlu1 %v3941_v13 }
 0x17c   :  { %573 = vperm.xlu1 %2396, %v2646_v18  }
 0x180   :  { %v3231_v1 = vpop.permute.xlu1 %76  ;;  %2397 = vset.pattern.permute.xlu1 %v3945_v36 }
 0x181   :  { %783 = vperm.xlu1 %2397, %v2639_v17   ;;  %v239_v17 = vmul.f32 %v2997_v29, %v2719_v27  ;;  %v339_v27 = vmul.f32 %v3021_v59, %v2830_v60 }
 0x183   :  { %v255_v37 = vadd.f32 %v239_v17, %v154_v50  ;;  %v355_v63 = vadd.f32 %v339_v27, %v254_v4  ;;  %v2458_v4 = vld [vmem:[%s3875_s1 + $0x8] sm:$0xff] }
 0x185   :  { %v3235_v11 = vpop.permute.xlu1 %169  ;;  %787 = vperm.xlu1 %2397, %v2456_v6   ;;  %v456_v28 = vadd.f32 %v440_v49, %v355_v63  ;;  %v2457_v6 = vld [vmem:[%s3875_s1 + $0x18] sm:$0xff] }
 0x187   :  { %v557_v41 = vadd.f32 %v541_v43, %v456_v28  ;;  %v868_v43 = vld [vmem:[%s3876_s2 + $0x10] sm:$0xff] }
 0x189   :  { %2399 = vset.pattern.permute.xlu1 %v3922_v34  ;;  %v658_v21 = vadd.f32 %v642_v35, %v557_v41  ;;  %v3954_v41 = vld [vmem:[#allocation18_spill] sm:$0xff] }
 0x18a   :  { %v3246_v25 = vpop.permute.xlu1 %379  ;;  %919 = vperm.xlu1 %2399, %v873_v10   ;;  %v812_v10 = vpop.permute.xlu0 %811 }
 0x18b   :  { %v759_v50 = vadd.f32 %v743_v57, %v658_v21  ;;  %v845_v51 = vmul.f32 %v3091_v44, %v812_v10  ;;  %v151_v57 = vmul.f32 %v3002_v48, %v3954_v41  ;;  %v2412_v10 = vld [vmem:[%s3877_s3] sm:$0xff]   ;;  %v741_v41 = vmul.f32 %v3086_v30, %v3224_v54 }
 0x18c   :  { %v3956_v21 = vld [vmem:[#allocation10_spill] sm:$0xff]  ;;  %2252 = vmatprep.mubr.bf16.mxu0 %v2412_v10 }
 0x18e   :  { %v3254_v7 = vpop.permute.xlu1 %383  ;;  %2400 = vset.pattern.permute.xlu1 %v3927_v23  ;;  %v356_v23 = vadd.f32 %v340_v2, %v255_v37  ;;  %v860_v2 = vadd.f32 %v844_v22, %v759_v50  ;;  %v3957_v50 = vld [vmem:[#allocation30_spill] sm:$0xff] }
 0x18f   :  { %464 = vperm.xlu1 %2400, %v2653_v19  }
 0x190   :  { %v457_v60 = vadd.f32 %v441_v52, %v356_v23 }
 0x192   :  { %v558_v33 = vadd.f32 %v542_v38, %v457_v60 }
 0x193   :  { %v3266_v47 = vpop.permute.xlu1 %593  ;;  %2402 = vset.pattern.permute.xlu1 %v3930_v45 }
 0x194   :  { %674 = vperm.xlu1 %2402, %v2646_v18   ;;  %v659_v17 = vadd.f32 %v643_v31, %v558_v33  ;;  %v3953_v31 = vld [vmem:[#allocation16_spill] sm:$0xff] }
 0x195   :  { %v152_v33 = vmul.f32 %v3002_v48, %v3953_v31  ;;  %v641_v31 = vmul.f32 %v3069_v61, %v3189_v15 }
 0x196   :  { %v760_v0 = vadd.f32 %v744_v5, %v659_v17  ;;  %v3955_v5 = vld [vmem:[#allocation22_spill] sm:$0xff]  ;;  %v337_v17 = vmul.f32 %v3021_v59, %v3956_v21 }
 0x198   :  { %v3282_v9 = vpop.permute.xlu1 %799  ;;  %678 = vperm.xlu1 %2402, %v2457_v6   ;;  %v861_v37 = vadd.f32 %v845_v51, %v760_v0  ;;  %v237_v6 = vmul.f32 %v2997_v29, %v3955_v5  ;;  %v338_v0 = vmul.f32 %v3021_v59, %v3957_v50 }
 0x199   :  { %v842_v15 = vmul.f32 %v3091_v44, %v3282_v9 }
 0x19c   :  { %2404 = vset.pattern.permute.xlu1 %v3941_v13  ;;  %v870_v13 = vld [vmem:[%s3876_s2 + $0x20] sm:$0xff] }
 0x19d   :  { %v935_v58 = vpop.permute.xlu1 %934  ;;  %569 = vperm.xlu1 %2404, %v2458_v4  }
 0x19e   :  { %v972_v27 = vadd.f32 %v935_v58, %v860_v2  ;;  %v1048_v58 = vld [vmem:[%s3878_s4 + $0x70] sm:$0xff] }
 0x19f   :  { %v3958_v2 = vld [vmem:[#allocation39_spill] sm:$0xff] }
 0x1a0   :  { %v988_v46 = vmax.f32 %v972_v27, 0.0  ;;  %v3959_v27 = vld [vmem:[#allocation41_spill] sm:$0xff] }
 0x1a1   :  { %v940_v49 = vpop.permute.xlu1 %939  ;;  %2405 = vset.pattern.permute.xlu1 %v3945_v36 }
 0x1a2   :  { %v973_v63 = vadd.f32 %v940_v49, %v861_v37  ;;  %775 = vperm.xlu1 %2405, %v2646_v18   ;;  %v438_v37 = vmul.f32 %v3038_v42, %v3958_v2  ;;  %v439_v49 = vmul.f32 %v3038_v42, %v3959_v27  ;;  %v1058_v27 = vld [vmem:[%s3878_s4 + $0xc0] sm:$0xff] }
 0x1a4   :  { %v989_v39 = vmax.f32 %v973_v63, 0.0 }
 0x1a6   :  { %v3299_v52 = vpop.permute.xlu1 %274  ;;  %2406 = vset.pattern.permute.xlu1 %v3922_v34  ;;  %v1031_v23 = vpack.c.bf16 %v989_v39, %v988_v46  ;;  %v539_v39 = vmul.f32 %v3059_v53, %v3127_v16  ;;  %v1046_v16 = vld [vmem:[%s3878_s4 + $0x60] sm:$0xff] }
 0x1a7   :  { %904 = vperm.xlu1 %2406, %v870_v13   ;;  %v1062_v13 = vld [vmem:[%s3878_s4 + $0xe0] sm:$0xff] }
 0x1a8   :  { %2240 = vmatprep.subr.bf16.mxu0 %v1031_v23 }
 0x1a9   :  { %2241 = vmatpush3.bf16.msra.mxu0 %v1031_v23 }
 0x1ab   :  { %v3305_v38 = vpop.permute.xlu1 %480  ;;  %909 = vperm.xlu1 %2406, %v871_v3   ;;  %v3960_v3 = vld [vmem:[#allocation27_spill] sm:$0xff] }
 0x1af   :  { %2408 = vset.pattern.permute.xlu1 %v3930_v45  ;;  %v869_v45 = vld [vmem:[%s3876_s2 + $0x18] sm:$0xff] }
 0x1b0   :  { %v3308_v18 = vpop.permute.xlu1 %690  ;;  %670 = vperm.xlu1 %2408, %v2458_v4   ;;  %v253_v4 = vadd.f32 %v237_v6, %v152_v33  ;;  %v804_v6 = vpop.permute.xlu0 %803 }
 0x1b1   :  { %v843_v54 = vmul.f32 %v3091_v44, %v804_v6 }
 0x1b2   :  { %v354_v63 = vadd.f32 %v338_v0, %v253_v4 }
 0x1b4   :  { %v3310_v40 = vpop.permute.xlu1 %694  ;;  %2409 = vset.pattern.permute.xlu1 %v3945_v36  ;;  %v3952_v36 = vld [vmem:[#allocation20_spill] sm:$0xff] }
 0x1b5   :  { %767 = vperm.xlu1 %2409, %v2653_v19   ;;  %v867_v19 = vld [vmem:[%s3876_s2 + $0x8] sm:$0xff]  ;;  %v236_v55 = vmul.f32 %v2997_v29, %v3952_v36  ;;  %v3961_v36 = vld [vmem:[#allocation36_spill] sm:$0xff] }
 0x1b7   :  { %v252_v22 = vadd.f32 %v236_v55, %v151_v57  ;;  %v640_v55 = vmul.f32 %v3069_v61, %v3961_v36  ;;  %v742_v57 = vmul.f32 %v3086_v30, %v3227_v56  ;;  %v1054_v36 = vld [vmem:[%s3878_s4 + $0xa0] sm:$0xff] }
 0x1b9   :  { %v3317_v60 = vpop.permute.xlu1 %66  ;;  %2410 = vset.pattern.permute.xlu1 %v3922_v34  ;;  %v1064_v34 = vld [vmem:[%s3878_s4 + $0xf0] sm:$0xff]  ;;  %v353_v46 = vadd.f32 %v337_v17, %v252_v22 }
 0x1ba   :  { %894 = vperm.xlu1 %2410, %v868_v43   ;;  %v540_v43 = vmul.f32 %v3059_v53, %v3960_v3  ;;  %v1060_v17 = vld [vmem:[%s3878_s4 + $0xd0] sm:$0xff] }
 0x1bb   :  { %v1056_v3 = vld [vmem:[%s3878_s4 + $0xb0] sm:$0xff] }
 0x1be   :  { %899 = vperm.xlu1 %2410, %v869_v45   ;;  %v3323_v28 = vpop.permute.xlu1 %161  ;;  %v454_v45 = vadd.f32 %v438_v37, %v353_v46 }
 0x1c2   :  { %889 = vperm.xlu1 %2410, %v867_v19   ;;  %v455_v19 = vadd.f32 %v439_v49, %v354_v63 }
 0x1c3   :  { %v3330_v35 = vpop.permute.xlu1 %371 }
 0x1c4   :  { %v556_v33 = vadd.f32 %v540_v43, %v455_v19 }
 0x1c6   :  { %1218 = vperm.xlu1 %2410, %v1064_v34   ;;  %v555_v34 = vadd.f32 %v539_v39, %v454_v45  ;;  %v657_v10 = vadd.f32 %v641_v31, %v556_v33  ;;  %v1040_v45 = vld [vmem:[%s3878_s4 + $0x30] sm:$0xff]  ;;  %v3963_v31 = vld [vmem:[#allocation37_spill] sm:$0xff] }
 0x1c7   :  { %v3348_v51 = vpop.permute.xlu1 %375 }
 0x1c8   :  { %v656_v21 = vadd.f32 %v640_v55, %v555_v34  ;;  %v758_v50 = vadd.f32 %v742_v57, %v657_v10  ;;  %v3962_v55 = vld [vmem:[#allocation17_spill] sm:$0xff]  ;;  %v3964_v57 = vld [vmem:[#allocation6_spill] sm:$0xff]  ;;  %v3965_v10 = vld [vmem:[#allocation11_spill] sm:$0xff] }
 0x1c9   :  { %v149_v34 = vmul.f32 %v3002_v48, %v3962_v55  ;;  %v235_v6 = vmul.f32 %v2997_v29, %v3964_v57 }
 0x1ca   :  { %1138 = vperm.xlu1 %2410, %v1048_v58   ;;  %v757_v22 = vadd.f32 %v741_v41, %v656_v21  ;;  %v1044_v58 = vld [vmem:[%s3878_s4 + $0x50] sm:$0xff]  ;;  %v859_v4 = vadd.f32 %v843_v54, %v758_v50  ;;  %v1038_v41 = vld [vmem:[%s3878_s4 + $0x20] sm:$0xff]  ;;  %v335_v21 = vmul.f32 %v3021_v59, %v3965_v10  ;;  %v336_v50 = vmul.f32 %v3021_v59, %v3120_v26 }
 0x1cb   :  { %v436_v54 = vmul.f32 %v3038_v42, %v3165_v20  ;;  %v1036_v20 = vld [vmem:[%s3878_s4 + $0x10] sm:$0xff]  ;;  %v1034_v10 = vld [vmem:[%s3878_s4] sm:$0xff] }
 0x1cc   :  { %v3362_v23 = vpop.permute.xlu1 %585  ;;  %v858_v56 = vadd.f32 %v842_v15, %v757_v22  ;;  %v3966_v15 = vld [vmem:[#allocation35_spill] sm:$0xff] }
 0x1ce   :  { %1208 = vperm.xlu1 %2410, %v1062_v13   ;;  %v1042_v13 = vld [vmem:[%s3878_s4 + $0x40] sm:$0xff] }
 0x1d1   :  { %v3377_v5 = vpop.permute.xlu1 %791 }
 0x1d2   :  { %1128 = vperm.xlu1 %2410, %v1046_v16   ;;  %v234_v16 = vmul.f32 %v2997_v29, %v3963_v31  ;;  %v740_v31 = vmul.f32 %v3086_v30, %v3310_v40 }
 0x1d4   :  { %v250_v22 = vadd.f32 %v234_v16, %v149_v34  ;;  %v840_v16 = vmul.f32 %v3091_v44, %v3377_v5  ;;  %v3969_v5 = vld [vmem:[#allocation23_spill] sm:$0xff] }
 0x1d6   :  { %1198 = vperm.xlu1 %2410, %v1060_v17   ;;  %v925_v0 = vpop.permute.xlu1 %924  ;;  %v150_v17 = vmul.f32 %v3002_v48, %v3966_v15 }
 0x1d7   :  { %v970_v2 = vadd.f32 %v925_v0, %v858_v56  ;;  %v1052_v56 = vld [vmem:[%s3878_s4 + $0x90] sm:$0xff] }
 0x1d9   :  { %v986_v49 = vmax.f32 %v970_v2, 0.0  ;;  %v437_v2 = vmul.f32 %v3038_v42, %v3172_v14 }
 0x1da   :  { %1118 = vperm.xlu1 %2410, %v1044_v58   ;;  %v930_v37 = vpop.permute.xlu1 %929  ;;  %v251_v58 = vadd.f32 %v235_v6, %v150_v17  ;;  %v796_v6 = vpop.permute.xlu0 %795 }
 0x1db   :  { %v971_v9 = vadd.f32 %v930_v37, %v859_v4  ;;  %v351_v4 = vadd.f32 %v335_v21, %v250_v22  ;;  %v537_v37 = vmul.f32 %v3059_v53, %v3220_v24  ;;  %v639_v24 = vmul.f32 %v3069_v61, %v3266_v47 }
 0x1dc   :  { %v841_v21 = vmul.f32 %v3091_v44, %v796_v6  ;;  %v143_v22 = vmul.f32 %v3002_v48, %v3969_v5  ;;  %v232_v6 = vmul.f32 %v2997_v29, %v3157_v32  ;;  %v3976_v5 = vld [vmem:[#allocation12_spill] sm:$0xff] }
 0x1dd   :  { %v987_v63 = vmax.f32 %v971_v9, 0.0  ;;  %v352_v9 = vadd.f32 %v336_v50, %v251_v58  ;;  %v452_v26 = vadd.f32 %v436_v54, %v351_v4  ;;  %v1561_v54 = vld [vmem:[%s3880_s6 + $0x70] sm:$0xff]  ;;  %v3971_v4 = vld [vmem:[#allocation14_spill] sm:$0xff] }
 0x1de   :  { %1188 = vperm.xlu1 %2410, %v1058_v27  }
 0x1df   :  { %v3391_v46 = vpop.permute.xlu1 %266  ;;  %v1030_v39 = vpack.c.bf16 %v987_v63, %v986_v49  ;;  %v3967_v49 = vld [vmem:[#allocation28_spill] sm:$0xff]  ;;  %v553_v14 = vadd.f32 %v537_v37, %v452_v26 }
 0x1e0   :  { %v538_v63 = vmul.f32 %v3059_v53, %v3967_v49 }
 0x1e1   :  { %2242 = vmatprep.subr.bf16.mxu0 %v1030_v39 }
 0x1e2   :  { %1108 = vperm.xlu1 %2410, %v1042_v13   ;;  %2243 = vmatpush3.bf16.msra.mxu0 %v1030_v39  ;;  %v3968_v39 = vld [vmem:[#allocation38_spill] sm:$0xff] }
 0x1e3   :  { %v638_v13 = vmul.f32 %v3069_v61, %v3968_v39  ;;  %v3972_v39 = vld [vmem:[#allocation15_spill] sm:$0xff] }
 0x1e4   :  { %v3399_v43 = vpop.permute.xlu1 %472 }
 0x1e5   :  { %v654_v34 = vadd.f32 %v638_v13, %v553_v14  ;;  %v430_v13 = vmul.f32 %v3038_v42, %v3972_v39 }
 0x1e6   :  { %1178 = vperm.xlu1 %2410, %v1056_v3   ;;  %v453_v3 = vadd.f32 %v437_v2, %v352_v9  ;;  %v329_v2 = vmul.f32 %v3021_v59, %v3971_v4 }
 0x1e8   :  { %v554_v55 = vadd.f32 %v538_v63, %v453_v3 }
 0x1e9   :  { %v3404_v19 = vpop.permute.xlu1 %682 }
 0x1ea   :  { %1098 = vperm.xlu1 %2410, %v1040_v45   ;;  %v739_v45 = vmul.f32 %v3086_v30, %v3308_v18  ;;  %v655_v57 = vadd.f32 %v639_v24, %v554_v55  ;;  %v228_v18 = vmul.f32 %v2997_v29, %v3323_v28  ;;  %v3973_v55 = vld [vmem:[#allocation43_spill] sm:$0xff] }
 0x1ec   :  { %v755_v47 = vadd.f32 %v739_v45, %v654_v34  ;;  %v756_v15 = vadd.f32 %v740_v31, %v655_v57  ;;  %v244_v50 = vadd.f32 %v228_v18, %v143_v22  ;;  %v632_v34 = vmul.f32 %v3069_v61, %v3973_v55  ;;  %v3974_v57 = vld [vmem:[#allocation19_spill] sm:$0xff] }
 0x1ed   :  { %v3413_v33 = vpop.permute.xlu1 %686  ;;  %v733_v31 = vmul.f32 %v3086_v30, %v3187_v12  ;;  %v3975_v12 = vld [vmem:[#allocation7_spill] sm:$0xff]  ;;  %v333_v22 = vmul.f32 %v3021_v59, %v3976_v5 }
 0x1ee   :  { %1168 = vperm.xlu1 %2410, %v1054_v36   ;;  %v1050_v36 = vld [vmem:[%s3878_s4 + $0x80] sm:$0xff]  ;;  %v856_v40 = vadd.f32 %v840_v16, %v755_v47  ;;  %v857_v28 = vadd.f32 %v841_v21, %v756_v15  ;;  %v345_v26 = vadd.f32 %v329_v2, %v244_v50  ;;  %v147_v47 = vmul.f32 %v3002_v48, %v3974_v57 }
 0x1ef   :  { %v1555_v21 = vld [vmem:[%s3880_s6 + $0x40] sm:$0xff]  ;;  %v148_v50 = vmul.f32 %v3002_v48, %v3150_v62  ;;  %v535_v62 = vmul.f32 %v3059_v53, %v3305_v38  ;;  %v1549_v38 = vld [vmem:[%s3880_s6 + $0x10] sm:$0xff]  ;;  %v738_v55 = vmul.f32 %v3086_v30, %v3413_v33  ;;  %v146_v57 = vmul.f32 %v3002_v48, %v3231_v1 }
 0x1f0   :  { %v446_v24 = vadd.f32 %v430_v13, %v345_v26  ;;  %v248_v32 = vadd.f32 %v232_v6, %v147_v47  ;;  %v1852_v33 = vld [vmem:[%s3882_s8] sm:$0xff]  ;;  %v332_v1 = vmul.f32 %v3021_v59, %v3299_v52 }
 0x1f2   :  { %1088 = vperm.xlu1 %2410, %v1038_v41   ;;  %v3428_v0 = vpop.permute.xlu1 %367  ;;  %v349_v2 = vadd.f32 %v333_v22, %v248_v32  ;;  %v433_v32 = vmul.f32 %v3038_v42, %v3348_v51  ;;  %v330_v51 = vmul.f32 %v3021_v59, %v3391_v46  ;;  %v533_v46 = vmul.f32 %v3059_v53, %v3399_v43 }
 0x1f6   :  { %1158 = vperm.xlu1 %2410, %v1052_v56   ;;  %v3970_v56 = vld [vmem:[#allocation24_spill] sm:$0xff] }
 0x1f7   :  { %v3437_v27 = vpop.permute.xlu1 %573  ;;  %v968_v58 = vadd.f32 %v3970_v56, %v856_v40  ;;  %v233_v40 = vmul.f32 %v2997_v29, %v3975_v12  ;;  %v334_v56 = vmul.f32 %v3021_v59, %v3216_v8  ;;  %v3980_v12 = vld [vmem:[#allocation21_spill] sm:$0xff] }
 0x1f9   :  { %v984_v49 = vmax.f32 %v968_v58, 0.0  ;;  %v434_v58 = vmul.f32 %v3038_v42, %v3246_v25  ;;  %v249_v4 = vadd.f32 %v233_v40, %v148_v50  ;;  %v145_v40 = vmul.f32 %v3002_v48, %v3980_v12 }
 0x1fa   :  { %1078 = vperm.xlu1 %2410, %v1036_v20   ;;  %v1559_v20 = vld [vmem:[%s3880_s6 + $0x60] sm:$0xff] }
 0x1fb   :  { %v450_v8 = vadd.f32 %v434_v58, %v349_v2 }
 0x1fc   :  { %v3457_v41 = vpop.permute.xlu1 %783 }
 0x1fe   :  { %1148 = vperm.xlu1 %2410, %v1050_v36   ;;  %v1557_v36 = vld [vmem:[%s3880_s6 + $0x50] sm:$0xff] }
 0x200   :  { %v3465_v17 = vpop.permute.xlu1 %787 }
 0x202   :  { %1068 = vperm.xlu1 %2410, %v1034_v10  }
 0x205   :  { %v920_v37 = vpop.permute.xlu1 %919 }
 0x206   :  { %v969_v9 = vadd.f32 %v920_v37, %v857_v28  ;;  %1635 = vperm.xlu1 %2410, %v1561_v54   ;;  %v1553_v28 = vld [vmem:[%s3880_s6 + $0x30] sm:$0xff]  ;;  %v435_v37 = vmul.f32 %v3038_v42, %v3254_v7  ;;  %v551_v7 = vadd.f32 %v535_v62, %v450_v8  ;;  %v3982_v62 = vld [vmem:[#allocation9_spill] sm:$0xff] }
 0x208   :  { %v985_v63 = vmax.f32 %v969_v9, 0.0  ;;  %v1551_v9 = vld [vmem:[%s3880_s6 + $0x20] sm:$0xff] }
 0x20a   :  { %v1029_v3 = vpack.c.bf16 %v985_v63, %v984_v49  ;;  %1625 = vperm.xlu1 %2410, %v1559_v20   ;;  %v465_v14 = vpop.permute.xlu1 %464  ;;  %v350_v20 = vadd.f32 %v334_v56, %v249_v4  ;;  %v3977_v49 = vld [vmem:[#allocation29_spill] sm:$0xff]  ;;  %v3978_v63 = vld [vmem:[#allocation40_spill] sm:$0xff]  ;;  %v144_v56 = vmul.f32 %v3002_v48, %v3317_v60  ;;  %v432_v60 = vmul.f32 %v3038_v42, %v3330_v35 }
 0x20b   :  { %v531_v45 = vmul.f32 %v3059_v53, %v465_v14  ;;  %v536_v25 = vmul.f32 %v3059_v53, %v3977_v49  ;;  %v636_v39 = vmul.f32 %v3069_v61, %v3978_v63  ;;  %v737_v14 = vmul.f32 %v3086_v30, %v3404_v19  ;;  %v1854_v4 = vld [vmem:[%s3882_s8 + $0x10] sm:$0xff] }
 0x20c   :  { %2244 = vmatprep.subr.bf16.mxu0 %v1029_v3  ;;  %v451_v13 = vadd.f32 %v435_v37, %v350_v20  ;;  %v839_v19 = vmul.f32 %v3091_v44, %v3465_v17  ;;  %v230_v17 = vmul.f32 %v2997_v29, %v3235_v11  ;;  %v3981_v11 = vld [vmem:[#allocation13_spill] sm:$0xff]  ;;  %v3983_v49 = vld [vmem:[#allocation31_spill] sm:$0xff] }
 0x20d   :  { %v547_v16 = vadd.f32 %v531_v45, %v446_v24  ;;  %2245 = vmatpush3.bf16.msra.mxu0 %v1029_v3  ;;  %v637_v3 = vmul.f32 %v3069_v61, %v3362_v23  ;;  %v331_v2 = vmul.f32 %v3021_v59, %v3981_v11  ;;  %v534_v48 = vmul.f32 %v3059_v53, %v3983_v49  ;;  %v2414_v49 = vld [vmem:[%s3877_s3 + $0x10] sm:$0xff]  }
 0x20e   :  { %1615 = vperm.xlu1 %2410, %v1557_v36   ;;  %v552_v45 = vadd.f32 %v536_v25, %v451_v13  ;;  %v652_v36 = vadd.f32 %v636_v39, %v551_v7  ;;  %v246_v52 = vadd.f32 %v230_v17, %v145_v40  ;;  %v431_v39 = vmul.f32 %v3038_v42, %v3428_v0  ;;  %v780_v0 = vpop.permute.xlu0 %779 }
 0x20f   :  { %v648_v18 = vadd.f32 %v632_v34, %v547_v16  ;;  %v3492_v10 = vpop.permute.xlu1 %674  ;;  %v838_v34 = vmul.f32 %v3091_v44, %v3457_v41  ;;  %v3979_v41 = vld [vmem:[#allocation8_spill] sm:$0xff]  ;;  %v634_v42 = vmul.f32 %v3069_v61, %v3437_v27 }
 0x210   :  { %v653_v16 = vadd.f32 %v637_v3, %v552_v45  ;;  %v753_v23 = vadd.f32 %v737_v14, %v652_v36  ;;  %v347_v59 = vadd.f32 %v331_v2, %v246_v52  ;;  %v735_v43 = vmul.f32 %v3086_v30, %v3492_v10  ;;  %v1857_v10 = vld [vmem:[%s3882_s8 + $0x28] sm:$0xff] }
 0x211   :  { %v3497_v15 = vadd.f32 %v733_v31, %v648_v18  ;;  %v1547_v31 = vld [vmem:[%s3880_s6] sm:$0xff] }
 0x212   :  { %1605 = vperm.xlu1 %2410, %v1555_v21   ;;  %v754_v6 = vadd.f32 %v738_v55, %v653_v16  ;;  %v854_v18 = vadd.f32 %v838_v34, %v753_v23  ;;  %v231_v21 = vmul.f32 %v2997_v29, %v3979_v41  ;;  %v448_v14 = vadd.f32 %v432_v60, %v347_v59  ;;  %v1856_v55 = vld [vmem:[%s3882_s8 + $0x20] sm:$0xff]  ;;  %v772_v12 = vpop.permute.xlu0 %771  ;;  %v2423_v59 = vld [vmem:[%s3877_s3 + $0x58] sm:$0xff]  }
 0x213   :  { %v3505_v54 = vpop.permute.xlu1 %678  ;;  %v3985_v23 = vld [vmem:[#allocation33_spill] sm:$0xff] }
 0x214   :  { %v855_v22 = vadd.f32 %v839_v19, %v754_v6  ;;  %v247_v50 = vadd.f32 %v231_v21, %v146_v57  ;;  %v549_v34 = vadd.f32 %v533_v46, %v448_v14  ;;  %v532_v19 = vmul.f32 %v3059_v53, %v3985_v23  ;;  %v2416_v60 = vld [vmem:[%s3877_s3 + $0x20] sm:$0xff]  }
 0x215   :  { %v2424_v46 = vld [vmem:[%s3877_s3 + $0x60] sm:$0xff]  }
 0x216   :  { %1595 = vperm.xlu1 %2410, %v1553_v28   ;;  %v348_v37 = vadd.f32 %v332_v1, %v247_v50  ;;  %v650_v27 = vadd.f32 %v634_v42, %v549_v34 }
 0x218   :  { %v3521_v26 = vpop.permute.xlu1 %569  ;;  %v449_v25 = vadd.f32 %v433_v32, %v348_v37  ;;  %v835_v32 = vmul.f32 %v3091_v44, %v772_v12 }
 0x21a   :  { %1585 = vperm.xlu1 %2410, %v1551_v9   ;;  %v229_v9 = vmul.f32 %v2997_v29, %v3982_v62  ;;  %v1997_v29 = vld [vmem:[%s3883_s9] sm:$0xff]  ;;  %v550_v45 = vadd.f32 %v534_v48, %v449_v25  ;;  %v2415_v48 = vld [vmem:[%s3877_s3 + $0x18] sm:$0xff]   ;;  %v2417_v25 = vld [vmem:[%s3877_s3 + $0x28] sm:$0xff]  }
 0x21c   :  { %v245_v63 = vadd.f32 %v229_v9, %v144_v56  ;;  %v1859_v56 = vld [vmem:[%s3882_s8 + $0x38] sm:$0xff] }
 0x21d   :  { %v3534_v24 = vpop.permute.xlu1 %775 }
 0x21e   :  { %1575 = vperm.xlu1 %2410, %v1549_v38   ;;  %v3984_v38 = vld [vmem:[#allocation42_spill] sm:$0xff]  ;;  %v346_v35 = vadd.f32 %v330_v51, %v245_v63  ;;  %v836_v6 = vmul.f32 %v3091_v44, %v3534_v24  ;;  %v1858_v24 = vld [vmem:[%s3882_s8 + $0x30] sm:$0xff] }
 0x21f   :  { %v635_v3 = vmul.f32 %v3069_v61, %v3984_v38  ;;  %v2418_v63 = vld [vmem:[%s3877_s3 + $0x30] sm:$0xff]   ;;  %v2425_v38 = vld [vmem:[%s3877_s3 + $0x68] sm:$0xff]  }
 0x220   :  { %v447_v36 = vadd.f32 %v431_v39, %v346_v35  ;;  %v2419_v39 = vld [vmem:[%s3877_s3 + $0x38] sm:$0xff]  }
 0x221   :  { %v651_v57 = vadd.f32 %v635_v3, %v550_v45  ;;  %v2426_v3 = vld [vmem:[%s3877_s3 + $0x70] sm:$0xff]   ;;  %v2427_v35 = vld [vmem:[%s3877_s3 + $0x78] sm:$0xff]  }
 0x222   :  { %1565 = vperm.xlu1 %2410, %v1547_v31   ;;  %v905_v47 = vpop.permute.xlu1 %904  ;;  %v736_v31 = vmul.f32 %v3086_v30, %v3505_v54  ;;  %v751_v54 = vadd.f32 %v735_v43, %v650_v27 }
 0x223   :  { %v966_v5 = vadd.f32 %v905_v47, %v854_v18  ;;  %v633_v47 = vmul.f32 %v3069_v61, %v3521_v26  ;;  %v837_v18 = vmul.f32 %v3091_v44, %v780_v0 }
 0x224   :  { %v752_v41 = vadd.f32 %v736_v31, %v651_v57  ;;  %v852_v26 = vadd.f32 %v836_v6, %v751_v54  ;;  %v2430_v54 = vld [vmem:[%s3879_s5 + $0x4] ss:$8 sps:$4 sm:$0xff]  }
 0x225   :  { %v982_v20 = vmax.f32 %v966_v5, 0.0  ;;  %1755 = vmatprep.mubr.bf16.mxu1 %v2430_v54 }
 0x226   :  { %1862 = vperm.xlu1 %2410, %v1852_v33   ;;  %v910_v28 = vpop.permute.xlu1 %909  ;;  %v548_v33 = vadd.f32 %v532_v19, %v447_v36 }
 0x227   :  { %v967_v58 = vadd.f32 %v910_v28, %v855_v22  ;;  %v853_v22 = vadd.f32 %v837_v18, %v752_v41  ;;  %v885_v28 = vpop.permute.xlu0 %884 }
 0x228   :  { %v649_v61 = vadd.f32 %v633_v47, %v548_v33 }
 0x229   :  { %v983_v8 = vmax.f32 %v967_v58, 0.0 }
 0x22a   :  { %1872 = vperm.xlu1 %2410, %v1854_v4  }
 0x22b   :  { %v1028_v13 = vpack.c.bf16 %v983_v8, %v982_v20  ;;  %v671_v7 = vpop.permute.xlu1 %670  ;;  %v2066_v20 = vld [vmem:[#allocation2] sm:$0x1]  ;;  %v2413_v8 = vld [vmem:[%s3877_s3 + $0x8] sm:$0xff]   ;;  %v3663_v45 = vpop.permute.xlu0 %1223 }
 0x22c   :  { %v734_v53 = vmul.f32 %v3086_v30, %v671_v7  ;;  %v2421_v7 = vld [vmem:[%s3877_s3 + $0x48] sm:$0xff]  }
 0x22d   :  { %2246 = vmatprep.subr.bf16.mxu0 %v1028_v13 }
 0x22e   :  { %2007 = vperm.xlu1 %2410, %v1997_v29   ;;  %2247 = vmatpush3.bf16.msra.mxu0 %v1028_v13  ;;  %v750_v17 = vadd.f32 %v734_v53, %v649_v61  ;;  %v2420_v13 = vld [vmem:[%s3877_s3 + $0x40] sm:$0xff]   ;;  %v2422_v29 = vld [vmem:[%s3877_s3 + $0x50] sm:$0xff]  }
 0x22f   :  { %v3667_v0 = vpop.permute.xlu0 %1143 }
 0x230   :  { %v768_v16 = vpop.permute.xlu1 %767  ;;  %v851_v2 = vadd.f32 %v835_v32, %v750_v17 }
 0x231   :  { %v834_v21 = vmul.f32 %v3091_v44, %v768_v16 }
 0x232   :  { %1882 = vperm.xlu1 %2410, %v1856_v55  }
 0x233   :  { %v850_v1 = vadd.f32 %v834_v21, %v3497_v15  ;;  %v2003_v15 = vld [vmem:[%s3883_s9 + $0x30] sm:$0xff]  ;;  %v3671_v55 = vpop.permute.xlu0 %1213 }
 0x235   :  { %v895_v40 = vpop.permute.xlu1 %894  ;;  %v962_v58 = vadd.f32 %v885_v28, %v850_v1 }
 0x236   :  { %1887 = vperm.xlu1 %2410, %v1857_v10   ;;  %v964_v5 = vadd.f32 %v895_v40, %v852_v26 }
 0x237   :  { %v978_v44 = vmax.f32 %v962_v58, 0.0  ;;  %v3675_v43 = vpop.permute.xlu0 %1133 }
 0x238   :  { %v980_v4 = vmax.f32 %v964_v5, 0.0 }
 0x239   :  { %v900_v50 = vpop.permute.xlu1 %899 }
 0x23a   :  { %v965_v30 = vadd.f32 %v900_v50, %v853_v22  ;;  %1892 = vperm.xlu1 %2410, %v1858_v24  }
 0x23b   :  { %v3679_v16 = vpop.permute.xlu0 %1203 }
 0x23c   :  { %v981_v11 = vmax.f32 %v965_v30, 0.0 }
 0x23d   :  { %v890_v52 = vpop.permute.xlu1 %889 }
 0x23e   :  { %v1027_v37 = vpack.c.bf16 %v981_v11, %v980_v4  ;;  %v963_v62 = vadd.f32 %v890_v52, %v851_v2  ;;  %1897 = vperm.xlu1 %2410, %v1859_v56  }
 0x23f   :  { %v3683_v19 = vpop.permute.xlu0 %1123 }
 0x240   :  { %v979_v9 = vmax.f32 %v963_v62, 0.0  ;;  %2248 = vmatprep.subr.bf16.mxu0 %v1027_v37 }
 0x241   :  { %2249 = vmatpush3.bf16.msra.mxu0 %v1027_v37  ;;  %v3661_v14 = vpop.permute.xlu1 %1218 }
 0x242   :  { %v1026_v51 = vpack.c.bf16 %v979_v9, %v978_v44  ;;  %2037 = vperm.xlu1 %2410, %v2003_v15  }
 0x243   :  { %v3687_v57 = vpop.permute.xlu0 %1193 }
 0x244   :  { %2250 = vmatprep.subr.bf16.mxu0 %v1026_v51 }
 0x245   :  { %2251 = vmatpush3.bf16.msra.mxu0 %v1026_v51  ;;  %v3665_v42 = vpop.permute.xlu1 %1138 }
 0x246   :  { %2069 = vperm.xlu1 %2410, %v2066_v20  }
 0x247   :  { %v3691_v6 = vpop.permute.xlu0 %1113 }
 0x248   :  { %2253 = vmatmul.mubr.bf16.vlgmr.msra.gmra.mxu0 %v2413_v8 }
 0x249   :  { %2256 = vmatprep.mubr.bf16.mxu0 %v2414_v49  ;;  %v3669_v36 = vpop.permute.xlu1 %1208 }
 0x24b   :  { %v3695_v33 = vpop.permute.xlu0 %1183 }
 0x24d   :  { %v3673_v34 = vpop.permute.xlu1 %1128 }
 0x24f   :  { %v1104_v41 = vpop.permute.xlu0 %1103 }
 0x250   :  { %2257 = vmatmul.mubr.bf16.gmra.mxu0 %v2415_v48 }
 0x251   :  { %2260 = vmatprep.mubr.bf16.mxu0 %v2416_v60  ;;  %v3677_v31 = vpop.permute.xlu1 %1198 }
 0x253   :  { %v3702_v21 = vpop.permute.xlu0 %1173 }
 0x255   :  { %v3681_v23 = vpop.permute.xlu1 %1118 }
 0x257   :  { %v1094_v40 = vpop.permute.xlu0 %1093 }
 0x258   :  { %2261 = vmatmul.mubr.bf16.gmra.mxu0 %v2417_v25 }
 0x259   :  { %2264 = vmatprep.mubr.bf16.mxu0 %v2418_v63  ;;  %v3685_v27 = vpop.permute.xlu1 %1188 }
 0x25b   :  { %v3706_v26 = vpop.permute.xlu0 %1163 }
 0x25d   :  { %v3689_v47 = vpop.permute.xlu1 %1108 }
 0x25f   :  { %v1084_v17 = vpop.permute.xlu0 %1083 }
 0x260   :  { %2265 = vmatmul.mubr.bf16.gmra.mxu0 %v2419_v39 }
 0x261   :  { %2268 = vmatprep.mubr.bf16.mxu0 %v2420_v13  ;;  %v3693_v18 = vpop.permute.xlu1 %1178 }
 0x263   :  { %v3710_v5 = vpop.permute.xlu0 %1153 }
 0x265   :  { %v1099_v10 = vpop.permute.xlu1 %1098 }
 0x267   :  { %v1074_v4 = vpop.permute.xlu0 %1073 }
 0x268   :  { %2269 = vmatmul.mubr.bf16.gmra.mxu0 %v2421_v7 }
 0x269   :  { %2272 = vmatprep.mubr.bf16.mxu0 %v2422_v29  ;;  %v3700_v53 = vpop.permute.xlu1 %1168 }
 0x26d   :  { %v1089_v12 = vpop.permute.xlu1 %1088 }
 0x270   :  { %2273 = vmatmul.mubr.bf16.gmra.mxu0 %v2423_v59 }
 0x271   :  { %2276 = vmatprep.mubr.bf16.mxu0 %v2424_v46  ;;  %v3704_v61 = vpop.permute.xlu1 %1158 }
 0x275   :  { %v1079_v24 = vpop.permute.xlu1 %1078 }
 0x278   :  { %2277 = vmatmul.mubr.bf16.gmra.mxu0 %v2425_v38 }
 0x279   :  { %2280 = vmatprep.mubr.bf16.mxu0 %v2426_v3  ;;  %v3708_v1 = vpop.permute.xlu1 %1148 }
 0x27d   :  { %v1069_v30 = vpop.permute.xlu1 %1068 }
 0x280   :  { %2281 = vmatmul.mubr.bf16.gmra.mxu0 %v2427_v35 }
 0x308   :  { %v2254_v22 = vpop.f32.mrf.mxu0 }
 0x309   :  { %v1365_v32 = vadd.f32 %v2254_v22, %v1079_v24 }
 0x30a   :  { %v1356_v50 = vpop.f32.mrf.mxu0 }
 0x30b   :  { %v1357_v56 = vadd.f32 %v1356_v50, %v1069_v30  ;;  %v1485_v2 = vmax.f32 %v1365_v32, 0.0 }
 0x30c   :  { %v2255_v28 = vpop.f32.mrf.mxu0 }
 0x30d   :  { %v1368_v58 = vadd.f32 %v2255_v28, %v1084_v17  ;;  %v1483_v15 = vmax.f32 %v1357_v56, 0.0 }
 0x30e   :  { %v1359_v11 = vpop.f32.mrf.mxu0 }
 0x30f   :  { %v1486_v52 = vmax.f32 %v1368_v58, 0.0  ;;  %v1360_v37 = vadd.f32 %v1359_v11, %v1074_v4 }
 0x310   :  { %v2258_v62 = vpop.f32.mrf.mxu0 }
 0x311   :  { %v3712_v44 = vpack.c.bf16 %v1486_v52, %v1485_v2  ;;  %v1484_v9 = vmax.f32 %v1360_v37, 0.0  ;;  %v1381_v8 = vadd.f32 %v2258_v62, %v1099_v10 }
 0x312   :  { %v1372_v51 = vpop.f32.mrf.mxu0 }
 0x313   :  { %v3714_v20 = vpack.c.bf16 %v1484_v9, %v1483_v15  ;;  %v1373_v48 = vadd.f32 %v1372_v51, %v1089_v12  ;;  %v1489_v63 = vmax.f32 %v1381_v8, 0.0 }
 0x314   :  { %v2259_v49 = vpop.f32.mrf.mxu0 }
 0x315   :  { %v1384_v60 = vadd.f32 %v2259_v49, %v1104_v41  ;;  %v1487_v29 = vmax.f32 %v1373_v48, 0.0 }
 0x316   :  { %v1375_v25 = vpop.f32.mrf.mxu0 }
 0x317   :  { %v1490_v39 = vmax.f32 %v1384_v60, 0.0  ;;  %v1376_v13 = vadd.f32 %v1375_v25, %v1094_v40 }
 0x318   :  { %v2262_v7 = vpop.f32.mrf.mxu0 }
 0x319   :  { %v3716_v59 = vpack.c.bf16 %v1490_v39, %v1489_v63  ;;  %v1488_v46 = vmax.f32 %v1376_v13, 0.0 }
 0x31a   :  { %v1388_v38 = vpop.f32.mrf.mxu0 }
 0x31b   :  { %v3718_v3 = vpack.c.bf16 %v1488_v46, %v1487_v29 }
 0x31c   :  { %v2263_v35 = vpop.f32.mrf.mxu0 }
 0x31e   :  { %v1391_v54 = vpop.f32.mrf.mxu0 }
 0x320   :  { %v2266_v24 = vpop.f32.mrf.mxu0 }
 0x321   :  { %v1413_v9 = vadd.f32 %v2266_v24, %v3665_v42 }
 0x322   :  { %v1404_v17 = vpop.f32.mrf.mxu0 }
 0x323   :  { %v1497_v29 = vmax.f32 %v1413_v9, 0.0 }
 0x324   :  { %v2267_v10 = vpop.f32.mrf.mxu0 }
 0x325   :  { %v1416_v37 = vadd.f32 %v2267_v10, %v3667_v0 }
 0x326   :  { %v1407_v22 = vpop.f32.mrf.mxu0 }
 0x327   :  { %v1498_v48 = vmax.f32 %v1416_v37, 0.0  ;;  %v1408_v60 = vadd.f32 %v1407_v22, %v3675_v43 }
 0x328   :  { %v3720_v12 = vpop.f32.mrf.mxu0 }
 0x329   :  { %v1496_v10 = vmax.f32 %v1408_v60, 0.0  ;;  %v2443_v60 = vld [vmem:[%s3879_s5 + $0x54] ss:$8 sps:$4 sm:$0xff]  }
 0x32a   :  { %v3722_v41 = vpop.f32.mrf.mxu0 }
 0x32c   :  { %v3724_v50 = vpop.f32.mrf.mxu0 }
 0x32e   :  { %v3726_v40 = vpop.f32.mrf.mxu0 }
 0x330   :  { %v2274_v32 = vpop.f32.mrf.mxu0 }
 0x332   :  { %v1436_v30 = vpop.f32.mrf.mxu0 }
 0x334   :  { %v2275_v28 = vpop.f32.mrf.mxu0 }
 0x336   :  { %v1439_v56 = vpop.f32.mrf.mxu0 }
 0x338   :  { %v2278_v58 = vpop.f32.mrf.mxu0 }
 0x339   :  { %v1461_v42 = vadd.f32 %v2278_v58, %v3677_v31 }
 0x33a   :  { %v1452_v4 = vpop.f32.mrf.mxu0 }
 0x33b   :  { %v1509_v37 = vmax.f32 %v1461_v42, 0.0 }
 0x33c   :  { %v2279_v11 = vpop.f32.mrf.mxu0 }
 0x33d   :  { %v1464_v63 = vadd.f32 %v2279_v11, %v3679_v16  ;;  %v1397_v11 = vadd.f32 %v2262_v7, %v3681_v23  ;;  %v1445_v23 = vadd.f32 %v2274_v32, %v3693_v18  ;;  %v1429_v32 = vadd.f32 %v3720_v12, %v3704_v61  ;;  %v2439_v12 = vld [vmem:[%s3879_s5 + $0x30] ss:$8 sps:$4 sm:$0xff]  }
 0x33e   :  { %v1455_v2 = vpop.f32.mrf.mxu0 }
 0x33f   :  { %v1510_v43 = vmax.f32 %v1464_v63, 0.0  ;;  %v1456_v22 = vadd.f32 %v1455_v2, %v3687_v57  ;;  %v1389_v57 = vadd.f32 %v1388_v38, %v3689_v47  ;;  %v1432_v47 = vadd.f32 %v3724_v50, %v3706_v26  ;;  %v2446_v63 = vld [vmem:[%s3879_s5 + $0x64] ss:$8 sps:$4 sm:$0xff]  }
 0x340   :  { %v2282_v52 = vpop.f32.mrf.mxu0 }
 0x341   :  { %v1477_v15 = vadd.f32 %v2282_v52, %v3661_v14  ;;  %v1405_v14 = vadd.f32 %v1404_v17, %v3673_v34  ;;  %v1538_v52 = vpack.c.bf16 %v1498_v48, %v1497_v29  ;;  %v1453_v34 = vadd.f32 %v1452_v4, %v3685_v27  ;;  %v3805_v29 = vpop.permute.xlu1 %1635 }
 0x342   :  { %v1468_v62 = vpop.f32.mrf.mxu0  ;;  %v1392_v17 = vadd.f32 %v1391_v54, %v3691_v6  ;;  %v1440_v4 = vadd.f32 %v1439_v56, %v3702_v21  ;;  %v1491_v6 = vmax.f32 %v1389_v57, 0.0  ;;  %v1505_v54 = vmax.f32 %v1445_v23, 0.0 }
 0x343   :  { %v1469_v8 = vadd.f32 %v1468_v62, %v3669_v36  ;;  %v1513_v39 = vmax.f32 %v1477_v15, 0.0  ;;  %v1508_v62 = vmax.f32 %v1456_v22, 0.0  ;;  %v1493_v15 = vmax.f32 %v1397_v11, 0.0 }
 0x344   :  { %v2283_v51 = vpop.f32.mrf.mxu0  ;;  %v1507_v7 = vmax.f32 %v1453_v34, 0.0  ;;  %v1492_v9 = vmax.f32 %v1392_v17, 0.0  ;;  %v1504_v18 = vmax.f32 %v1440_v4, 0.0  ;;  %v1502_v21 = vmax.f32 %v1432_v47, 0.0 }
 0x345   :  { %v1480_v49 = vadd.f32 %v2283_v51, %v3663_v45  ;;  %v1511_v46 = vmax.f32 %v1469_v8, 0.0  ;;  %v1400_v45 = vadd.f32 %v2263_v35, %v3683_v19  ;;  %v1448_v19 = vadd.f32 %v2275_v28, %v3695_v33  ;;  %v3809_v42 = vpop.permute.xlu1 %1625 }
 0x346   :  { %v1471_v25 = vpop.f32.mrf.mxu0  ;;  %v1544_v35 = vpack.c.bf16 %v1510_v43, %v1509_v37  ;;  %v1543_v51 = vpack.c.bf16 %v1508_v62, %v1507_v7  ;;  %v1437_v33 = vadd.f32 %v1436_v30, %v3700_v53  ;;  %v1535_v28 = vpack.c.bf16 %v1492_v9, %v1491_v6 }
 0x347   :  { %v1514_v13 = vmax.f32 %v1480_v49, 0.0  ;;  %v1472_v0 = vadd.f32 %v1471_v25, %v3671_v55  ;;  %v1495_v55 = vmax.f32 %v1405_v14, 0.0  ;;  %v1494_v31 = vmax.f32 %v1400_v45, 0.0  ;;  %v2445_v25 = vld [vmem:[%s3879_s5 + $0x50] ss:$8 sps:$4 sm:$0xff]   ;;  %v3807_v14 = vpop.permute.xlu0 %1640 }
 0x348   :  { %v1506_v27 = vmax.f32 %v1448_v19, 0.0  ;;  %v1503_v8 = vmax.f32 %v1437_v33, 0.0  ;;  %v1424_v56 = vadd.f32 %v3726_v40, %v3710_v5  ;;  %v1501_v53 = vmax.f32 %v1429_v32, 0.0  ;;  %v2428_v5 = vld [vmem:[%s3879_s5] ss:$8 sps:$4 sm:$0xff]  }
 0x349   :  { %v1512_v24 = vmax.f32 %v1472_v0, 0.0  ;;  %v1546_v36 = vpack.c.bf16 %v1514_v13, %v1513_v39  ;;  %v1537_v58 = vpack.c.bf16 %v1496_v10, %v1495_v55  ;;  %v1536_v2 = vpack.c.bf16 %v1494_v31, %v1493_v15  ;;  %v2442_v40 = vld [vmem:[%s3879_s5 + $0x40] ss:$8 sps:$4 sm:$0xff]   ;;  %v2449_v13 = vld [vmem:[%s3879_s5 + $0x74] ss:$8 sps:$4 sm:$0xff]   ;;  %v3819_v45 = vpop.permute.xlu1 %1615 }
 0x34a   :  { %v1542_v38 = vpack.c.bf16 %v1506_v27, %v1505_v54  ;;  %v1541_v49 = vpack.c.bf16 %v1504_v18, %v1503_v8  ;;  %v1421_v30 = vadd.f32 %v3722_v41, %v3708_v1  ;;  %v1540_v26 = vpack.c.bf16 %v1502_v21, %v1501_v53  ;;  %v2431_v1 = vld [vmem:[%s3879_s5 + $0x14] ss:$8 sps:$4 sm:$0xff]   ;;  %v2440_v41 = vld [vmem:[%s3879_s5 + $0x44] ss:$8 sps:$4 sm:$0xff]   ;;  %v2448_v39 = vld [vmem:[%s3879_s5 + $0x60] ss:$8 sps:$4 sm:$0xff]  }
 0x34b   :  { %v1545_v16 = vpack.c.bf16 %v1512_v24, %v1511_v46  ;;  %2160 = vmatprep.subr.bf16.mxu1 %v1546_v36  ;;  %v1500_v50 = vmax.f32 %v1424_v56, 0.0  ;;  %v2451_v0 = vld [vmem:[%s3879_s5 + $0x70] ss:$8 sps:$4 sm:$0xff]   ;;  %v3811_v46 = vpop.permute.xlu0 %1630  ;;  %v2452_v24 = vld [vmem:[%s3881_s7] sm:$0xff]  }
 0x34c   :  { %2161 = vmatpush3.bf16.msra.mxu1 %v1538_v52  ;;  %v1499_v48 = vmax.f32 %v1421_v30, 0.0  ;;  %v2453_v36 = vld [vmem:[%s3881_s7 + $0x10] sm:$0xff]   ;;  %2300 = vmatprep.mubr.bf16.mxu0 %v2452_v24 }
 0x34d   :  { %2162 = vmatprep.subr.bf16.mxu1 %v1545_v16  ;;  %v3823_v52 = vpop.permute.xlu1 %1605 }
 0x34e   :  { %v1539_v61 = vpack.c.bf16 %v1500_v50, %v1499_v48 }
 0x34f   :  { %v3821_v10 = vpop.permute.xlu0 %1620 }
 0x350   :  { %2163 = vmatpush3.bf16.msra.mxu1 %v1537_v58 }
 0x351   :  { %2164 = vmatprep.subr.bf16.mxu1 %v1544_v35  ;;  %v3827_v22 = vpop.permute.xlu1 %1595 }
 0x353   :  { %v3825_v43 = vpop.permute.xlu0 %1610 }
 0x354   :  { %2165 = vmatpush3.bf16.msra.mxu1 %v1536_v2 }
 0x355   :  { %2166 = vmatprep.subr.bf16.mxu1 %v1543_v51  ;;  %v3831_v11 = vpop.permute.xlu1 %1585 }
 0x357   :  { %v3829_v16 = vpop.permute.xlu0 %1600 }
 0x358   :  { %2167 = vmatpush3.bf16.msra.mxu1 %v1535_v28 }
 0x359   :  { %2168 = vmatprep.subr.bf16.mxu1 %v1542_v38  ;;  %v1576_v37 = vpop.permute.xlu1 %1575 }
 0x35b   :  { %v3833_v55 = vpop.permute.xlu0 %1590 }
 0x35c   :  { %2169 = vmatpush3.bf16.msra.mxu1 %v3716_v59  ;;  %v2433_v59 = vld [vmem:[%s3879_s5 + $0x10] ss:$8 sps:$4 sm:$0xff]  }
 0x35d   :  { %2170 = vmatprep.subr.bf16.mxu1 %v1541_v49  ;;  %v1566_v35 = vpop.permute.xlu1 %1565 }
 0x35f   :  { %v1581_v31 = vpop.permute.xlu0 %1580 }
 0x360   :  { %2171 = vmatpush3.bf16.msra.mxu1 %v3718_v3  ;;  %v2437_v3 = vld [vmem:[%s3879_s5 + $0x34] ss:$8 sps:$4 sm:$0xff]  }
 0x361   :  { %2172 = vmatprep.subr.bf16.mxu1 %v1540_v26 }
 0x363   :  { %v1571_v23 = vpop.permute.xlu0 %1570 }
 0x364   :  { %2173 = vmatpush3.bf16.msra.mxu1 %v3712_v44  ;;  %v2434_v44 = vld [vmem:[%s3879_s5 + $0x24] ss:$8 sps:$4 sm:$0xff]  }
 0x365   :  { %2174 = vmatprep.subr.bf16.mxu1 %v1539_v61 }
 0x368   :  { %2175 = vmatpush3.bf16.msra.mxu1 %v3714_v20  ;;  %v2436_v20 = vld [vmem:[%s3879_s5 + $0x20] ss:$8 sps:$4 sm:$0xff]  }
 0x36b   :  { %1756 = vmatmul.mubr.bf16.vlgmr.msra.gmra.mxu1 %v2428_v5 }
 0x36c   :  { %1763 = vmatprep.mubr.bf16.mxu1 %v2431_v1 }
 0x373   :  { %1764 = vmatmul.mubr.bf16.gmra.mxu1 %v2433_v59 }
 0x374   :  { %1771 = vmatprep.mubr.bf16.mxu1 %v2434_v44 }
 0x37b   :  { %1772 = vmatmul.mubr.bf16.gmra.mxu1 %v2436_v20 }
 0x37c   :  { %1779 = vmatprep.mubr.bf16.mxu1 %v2437_v3 }
 0x383   :  { %1780 = vmatmul.mubr.bf16.gmra.mxu1 %v2439_v12 }
 0x384   :  { %1787 = vmatprep.mubr.bf16.mxu1 %v2440_v41 }
 0x38b   :  { %1788 = vmatmul.mubr.bf16.gmra.mxu1 %v2442_v40 }
 0x38c   :  { %1795 = vmatprep.mubr.bf16.mxu1 %v2443_v60 }
 0x393   :  { %1796 = vmatmul.mubr.bf16.gmra.mxu1 %v2445_v25 }
 0x394   :  { %1803 = vmatprep.mubr.bf16.mxu1 %v2446_v63 }
 0x39b   :  { %1804 = vmatmul.mubr.bf16.gmra.mxu1 %v2448_v39 }
 0x39c   :  { %1811 = vmatprep.mubr.bf16.mxu1 %v2449_v13 }
 0x3a3   :  { %1812 = vmatmul.mubr.bf16.gmra.mxu1 %v2451_v0 }
 0x3a4   :  { %2304 = vmatprep.mubr.bf16.mxu1 %v2453_v36 }
 0x42b   :  { %v2176_v34 = vpop.f32.mrf.mxu1 }
 0x42d   :  { %v2177_v17 = vpop.f32.mrf.mxu1 }
 0x42e   :  { %v2178_v58 = vadd.f32 %v2177_v17, %v2176_v34 }
 0x42f   :  { %v2179_v19 = vpop.f32.mrf.mxu1 }
 0x430   :  { %v1758_v15 = vadd.f32 %v2178_v58, %v1566_v35 }
 0x431   :  { %v2180_v62 = vpop.f32.mrf.mxu1 }
 0x432   :  { %v2181_v57 = vadd.f32 %v2180_v62, %v2179_v19  ;;  %v1820_v27 = vmax.f32 %v1758_v15, 0.0 }
 0x433   :  { %v2182_v7 = vpop.f32.mrf.mxu1 }
 0x434   :  { %v1761_v2 = vadd.f32 %v2181_v57, %v1571_v23 }
 0x435   :  { %v2183_v9 = vpop.f32.mrf.mxu1 }
 0x436   :  { %v1821_v4 = vmax.f32 %v1761_v2, 0.0  ;;  %v2184_v51 = vadd.f32 %v2183_v9, %v2182_v7 }
 0x437   :  { %v2185_v6 = vpop.f32.mrf.mxu1 }
 0x438   :  { %v3835_v54 = vpack.c.bf16 %v1821_v4, %v1820_v27  ;;  %v1766_v28 = vadd.f32 %v2184_v51, %v1576_v37 }
 0x439   :  { %v2186_v33 = vpop.f32.mrf.mxu1 }
 0x43a   :  { %v2187_v47 = vadd.f32 %v2186_v33, %v2185_v6  ;;  %v1822_v8 = vmax.f32 %v1766_v28, 0.0 }
 0x43b   :  { %v3837_v38 = vpop.f32.mrf.mxu1 }
 0x43c   :  { %v1769_v18 = vadd.f32 %v2187_v47, %v1581_v31 }
 0x43d   :  { %v3839_v32 = vpop.f32.mrf.mxu1 }
 0x43e   :  { %v1823_v21 = vmax.f32 %v1769_v18, 0.0 }
 0x43f   :  { %v2191_v56 = vpop.f32.mrf.mxu1 }
 0x440   :  { %v3841_v49 = vpack.c.bf16 %v1823_v21, %v1822_v8 }
 0x441   :  { %v2192_v53 = vpop.f32.mrf.mxu1 }
 0x442   :  { %v2193_v28 = vadd.f32 %v2192_v53, %v2191_v56 }
 0x443   :  { %v2194_v30 = vpop.f32.mrf.mxu1 }
 0x445   :  { %v2195_v26 = vpop.f32.mrf.mxu1 }
 0x447   :  { %v2197_v50 = vpop.f32.mrf.mxu1 }
 0x449   :  { %v2198_v48 = vpop.f32.mrf.mxu1 }
 0x44b   :  { %v2200_v61 = vpop.f32.mrf.mxu1 }
 0x44d   :  { %v2201_v5 = vpop.f32.mrf.mxu1 }
 0x44e   :  { %v2202_v9 = vadd.f32 %v2201_v5, %v2200_v61 }
 0x44f   :  { %v2203_v1 = vpop.f32.mrf.mxu1 }
 0x451   :  { %v2204_v59 = vpop.f32.mrf.mxu1 }
 0x452   :  { %v2205_v15 = vadd.f32 %v2204_v59, %v2203_v1 }
 0x453   :  { %v2206_v44 = vpop.f32.mrf.mxu1 }
 0x455   :  { %v2207_v20 = vpop.f32.mrf.mxu1 }
 0x456   :  { %v2208_v19 = vadd.f32 %v2207_v20, %v2206_v44 }
 0x457   :  { %v2209_v3 = vpop.f32.mrf.mxu1 }
 0x458   :  { %v1798_v27 = vadd.f32 %v2208_v19, %v3819_v45 }
 0x459   :  { %v2210_v12 = vpop.f32.mrf.mxu1 }
 0x45a   :  { %v2211_v34 = vadd.f32 %v2210_v12, %v2209_v3 }
 0x45b   :  { %v2212_v41 = vpop.f32.mrf.mxu1 }
 0x45c   :  { %v1801_v57 = vadd.f32 %v2211_v34, %v3821_v10  ;;  %v1830_v10 = vmax.f32 %v1798_v27, 0.0 }
 0x45d   :  { %v2213_v40 = vpop.f32.mrf.mxu1 }
 0x45e   :  { %v2214_v36 = vadd.f32 %v2213_v40, %v2212_v41  ;;  %v1831_v6 = vmax.f32 %v1801_v57, 0.0 }
 0x45f   :  { %v2215_v60 = vpop.f32.mrf.mxu1 }
 0x460   :  { %v1806_v35 = vadd.f32 %v2214_v36, %v3809_v42  ;;  %v1790_v42 = vadd.f32 %v2202_v9, %v3823_v52  ;;  %v1849_v18 = vpack.c.bf16 %v1831_v6, %v1830_v10  ;;  %v1777_v52 = vadd.f32 %v2193_v28, %v3833_v55  ;;  %v2455_v55 = vld [vmem:[%s3881_s7 + $0x18] sm:$0xff]  }
 0x461   :  { %v2216_v25 = vpop.f32.mrf.mxu1 }
 0x462   :  { %v2217_v13 = vadd.f32 %v2216_v25, %v2215_v60  ;;  %v1832_v4 = vmax.f32 %v1806_v35, 0.0  ;;  %v1828_v21 = vmax.f32 %v1790_v42, 0.0  ;;  %v1825_v53 = vmax.f32 %v1777_v52, 0.0 }
 0x463   :  { %v2218_v63 = vpop.f32.mrf.mxu1 }
 0x464   :  { %v1809_v31 = vadd.f32 %v2217_v13, %v3811_v46  ;;  %v2199_v46 = vadd.f32 %v2198_v48, %v2197_v50 }
 0x465   :  { %v2219_v39 = vpop.f32.mrf.mxu1 }
 0x466   :  { %v2220_v0 = vadd.f32 %v2219_v39, %v2218_v63  ;;  %v1833_v23 = vmax.f32 %v1809_v31, 0.0  ;;  %v1785_v45 = vadd.f32 %v2199_v46, %v3829_v16 }
 0x467   :  { %v2221_v24 = vpop.f32.mrf.mxu1 }
 0x468   :  { %v1814_v17 = vadd.f32 %v2220_v0, %v3805_v29  ;;  %v1793_v29 = vadd.f32 %v2205_v15, %v3825_v43  ;;  %v1850_v33 = vpack.c.bf16 %v1833_v23, %v1832_v4  ;;  %v2190_v43 = vadd.f32 %v3839_v32, %v3837_v38  ;;  %v1863_v32 = vpop.permute.xlu1 %1862 }
 0x469   :  { %v2222_v37 = vpop.f32.mrf.mxu1 }
 0x46a   :  { %v2223_v58 = vadd.f32 %v2222_v37, %v2221_v24  ;;  %v1834_v7 = vmax.f32 %v1814_v17, 0.0  ;;  %v1829_v47 = vmax.f32 %v1793_v29, 0.0  ;;  %v1774_v16 = vadd.f32 %v2190_v43, %v3831_v11  ;;  %v2454_v11 = vld [vmem:[%s3881_s7 + $0x8] sm:$0xff]   ;;  %s2489_s7 = smov [#allocation3]  }
 0x46b   :  { %s2084_s6 = sshll.u32 %s2489_s7, 4  ;;  %s2085_s6 = int_to_ptr.vmem [resolvable:$true] %s2084_s6 }
 0x46c   :  { %v1817_v62 = vadd.f32 %v2223_v58, %v3807_v14  ;;  %v2196_v14 = vadd.f32 %v2195_v26, %v2194_v30  ;;  %v1827_v30 = vmax.f32 %v1785_v45, 0.0  ;;  %v1848_v26 = vpack.c.bf16 %v1829_v47, %v1828_v21  ;;  %v1873_v48 = vpop.permute.xlu1 %1872  ;;  %s2459_s28 = scalar_lea.vmem %s2085_s6, 16  ;;  %s2463_s29 = scalar_lea.vmem %s2085_s6, 32 }
 0x46d   :  { %v1824_v38 = vmax.f32 %v1774_v16, 0.0  ;;  %p2460_p0 = scmp.ne.s32.totalorder %s2085_s6, %s2459_s28  ;;  %p2464_p1 = scmp.lt.s32.totalorder %s2085_s6, %s2085_s6 }
 0x46e   :  { %v1835_v2 = vmax.f32 %v1817_v62, 0.0  ;;  %v1782_v8 = vadd.f32 %v2196_v14, %v3827_v22  ;;  %p2465_p2 = scmp.lt.s32.totalorder %s2463_s29, %s2459_s28 }
 0x46f   :  { %v1846_v22 = vpack.c.bf16 %v1825_v53, %v1824_v38 }
 0x470   :  { %v1851_v51 = vpack.c.bf16 %v1835_v2, %v1834_v7  ;;  %v1826_v56 = vmax.f32 %v1782_v8, 0.0  ;;  %v2008_v5 = vpop.permute.xlu1 %2007  ;;  %p2466_p3 = por %p2465_p2, %p2464_p1 }
 0x472   :  { %2284 = vmatprep.subr.bf16.mxu0 %v1851_v51  ;;  %2308 = vmatprep.subr.bf16.mxu1 %v1851_v51  ;;  %v1847_v50 = vpack.c.bf16 %v1827_v30, %v1826_v56  ;;  %v2072_v30 = vlaneseq  ;;  %p2467_p4 = pnand %p2466_p3, %p2460_p0 }
 0x473   :  { %2285 = vmatpush3.bf16.msra.mxu0 %v1851_v51  ;;  %2316 = vmatpush3.bf16.msra.mxu1 %v1851_v51 }
 0x474   :  { %2286 = vmatprep.subr.bf16.mxu0 %v1850_v33  ;;  %2309 = vmatprep.subr.bf16.mxu1 %v1850_v33  ;;  %v1883_v59 = vpop.permute.xlu1 %1882  ;;  %v2073_v56 = vshrl.u32 %v2072_v30, 7 }
 0x476   :  { %v2074_v38 = vsub.s32 0, %v2073_v56 }
 0x477   :  { %2287 = vmatpush3.bf16.msra.mxu0 %v1850_v33  ;;  %2317 = vmatpush3.bf16.msra.mxu1 %v1850_v33 }
 0x478   :  { %2288 = vmatprep.subr.bf16.mxu0 %v1849_v18  ;;  %2310 = vmatprep.subr.bf16.mxu1 %v1849_v18  ;;  %v1888_v12 = vpop.permute.xlu1 %1887 }
 0x47b   :  { %2289 = vmatpush3.bf16.msra.mxu0 %v1849_v18  ;;  %2318 = vmatpush3.bf16.msra.mxu1 %v1849_v18 }
 0x47c   :  { %2290 = vmatprep.subr.bf16.mxu0 %v1848_v26  ;;  %2311 = vmatprep.subr.bf16.mxu1 %v1848_v26  ;;  %v1893_v37 = vpop.permute.xlu1 %1892 }
 0x47f   :  { %2291 = vmatpush3.bf16.msra.mxu0 %v1848_v26  ;;  %2319 = vmatpush3.bf16.msra.mxu1 %v1848_v26 }
 0x480   :  { %2292 = vmatprep.subr.bf16.mxu0 %v1847_v50  ;;  %2312 = vmatprep.subr.bf16.mxu1 %v1847_v50  ;;  %v1898_v27 = vpop.permute.xlu1 %1897 }
 0x483   :  { %2293 = vmatpush3.bf16.msra.mxu0 %v1847_v50  ;;  %2320 = vmatpush3.bf16.msra.mxu1 %v1847_v50 }
 0x484   :  { %2294 = vmatprep.subr.bf16.mxu0 %v1846_v22  ;;  %2313 = vmatprep.subr.bf16.mxu1 %v1846_v22  ;;  %v2038_v47 = vpop.permute.xlu1 %2037 }
 0x487   :  { %2295 = vmatpush3.bf16.msra.mxu0 %v1846_v22  ;;  %2321 = vmatpush3.bf16.msra.mxu1 %v1846_v22 }
 0x488   :  { %2296 = vmatprep.subr.bf16.mxu0 %v3841_v49  ;;  %2314 = vmatprep.subr.bf16.mxu1 %v3841_v49 }
 0x48b   :  { %2297 = vmatpush3.bf16.msra.mxu0 %v3841_v49  ;;  %2322 = vmatpush3.bf16.msra.mxu1 %v3841_v49  ;;  %v1868_v49 = vpop.permute.xlu0 %1867 }
 0x48c   :  { %2298 = vmatprep.subr.bf16.mxu0 %v3835_v54  ;;  %2315 = vmatprep.subr.bf16.mxu1 %v3835_v54 }
 0x48f   :  { %2299 = vmatpush3.bf16.msra.mxu0 %v3835_v54  ;;  %2323 = vmatpush3.bf16.msra.mxu1 %v3835_v54  ;;  %v1878_v61 = vpop.permute.xlu0 %1877 }
 0x492   :  { %2301 = vmatmul.mubr.bf16.vlgmr.msra.gmra.mxu0 %v2454_v11  ;;  %2305 = vmatmul.mubr.bf16.vlgmr.msra.gmra.mxu1 %v2455_v55  ;;  %v2070_v11 = vpop.permute.xlu1 %2069 }
 0x493   :  { %v2013_v1 = vpop.permute.xlu0 %2012 }
 0x497   :  { %v2018_v44 = vpop.permute.xlu0 %2017 }
 0x49b   :  { %v2023_v60 = vpop.permute.xlu0 %2022 }
 0x49f   :  { %v2028_v19 = vpop.permute.xlu0 %2027 }
 0x4a3   :  { %v2033_v6 = vpop.permute.xlu0 %2032 }
 0x4a7   :  { %v2043_v8 = vpop.permute.xlu0 %2042 }
 0x552   :  { %v2302_v20 = vpop.f32.mrf.mxu0  ;;  %v2306_v3 = vpop.f32.mrf.mxu1 }
 0x553   :  { %v1967_v54 = vadd.f32 %v2302_v20, %v1873_v48  ;;  %v1983_v7 = vadd.f32 %v2306_v3, %v1893_v37 }
 0x554   :  { %v1958_v41 = vpop.f32.mrf.mxu0  ;;  %v1974_v40 = vpop.f32.mrf.mxu1 }
 0x555   :  { %v1959_v25 = vadd.f32 %v1958_v41, %v1863_v32  ;;  %v1991_v31 = vmax.f32 %v1967_v54, 0.0  ;;  %v1975_v17 = vadd.f32 %v1974_v40, %v1883_v59  ;;  %v1995_v33 = vmax.f32 %v1983_v7, 0.0 }
 0x556   :  { %v2303_v63 = vpop.f32.mrf.mxu0  ;;  %v2307_v39 = vpop.f32.mrf.mxu1  ;;  %v2075_v32 = vrot.slane %v2070_v11, %v2074_v38 }
 0x557   :  { %v1989_v0 = vmax.f32 %v1959_v25, 0.0  ;;  %v1970_v24 = vadd.f32 %v2303_v63, %v1878_v61  ;;  %v2047_v23 = vmul.f32 %v2018_v44, %v1991_v31  ;;  %v1993_v2 = vmax.f32 %v1975_v17, 0.0 }
 0x558   :  { %v1961_v13 = vpop.f32.mrf.mxu0  ;;  %v1977_v34 = vpop.f32.mrf.mxu1  ;;  %v1986_v51 = vadd.f32 %v2307_v39, %v1898_v27  ;;  %v2051_v18 = vmul.f32 %v2038_v47, %v1995_v33 }
 0x559   :  { %v1962_v36 = vadd.f32 %v1961_v13, %v1868_v49  ;;  %v2045_v35 = vmul.f32 %v2008_v5, %v1989_v0  ;;  %v1992_v62 = vmax.f32 %v1970_v24, 0.0  ;;  %v1978_v57 = vadd.f32 %v1977_v34, %v1888_v12 }
 0x55a   :  { %v2049_v14 = vmul.f32 %v2028_v19, %v1993_v2  ;;  %v1996_v10 = vmax.f32 %v1986_v51, 0.0 }
 0x55b   :  { %v1990_v58 = vmax.f32 %v1962_v36, 0.0  ;;  %v2048_v4 = vmul.f32 %v2023_v60, %v1992_v62  ;;  %v1994_v29 = vmax.f32 %v1978_v57, 0.0 }
 0x55c   :  { %v2052_v21 = vmul.f32 %v2043_v8, %v1996_v10 }
 0x55d   :  { %v2046_v15 = vmul.f32 %v2013_v1, %v1990_v58  ;;  %v2050_v28 = vmul.f32 %v2033_v6, %v1994_v29 }
 0x55f   :  { %v2053_v9 = vadd.f32 %v2046_v15, %v2045_v35 }
 0x561   :  { %v2054_v46 = vadd.f32 %v2053_v9, %v2047_v23 }
 0x563   :  { %v2055_v42 = vadd.f32 %v2054_v46, %v2048_v4 }
 0x565   :  { %v2056_v45 = vadd.f32 %v2055_v42, %v2049_v14 }
 0x567   :  { %v2057_v43 = vadd.f32 %v2056_v45, %v2050_v28 }
 0x569   :  { %v2058_v52 = vadd.f32 %v2057_v43, %v2051_v18 }
 0x56b   :  { %v2059_v26 = vadd.f32 %v2058_v52, %v2052_v21 }
 0x56d   :  { %v2060_v16 = vrot.slane %v2059_v26, 4 }
 0x56f   :  { %v2061_v53 = vadd.f32 %v2060_v16, %v2059_v26 }
 0x571   :  { %v2062_v50 = vrot.slane %v2061_v53, 2 }
 0x573   :  { %v2063_v22 = vadd.f32 %v2062_v50, %v2061_v53 }
 0x575   :  { %v2064_v55 = vrot.slane %v2063_v22, 1 }
 0x577   :  { %v2065_v49 = vadd.f32 %v2064_v55, %v2063_v22 }
 0x579   :  { %v2076_v48 = vadd.f32 %v2075_v32, %v2065_v49 }
 0x57b   :  { %2077 = vst [vmem:[#allocation3] sm:$0x1] %v2076_v48 }
 0x57c   :  { %2470 = shalt.err (!%p2467_p4)
}
 0x57d   :  { %2087 = dma.vmem_to_hbm [thread:$0]  %s2085_s6, 16, %s3885_s11, [#allocation4]  }
 0x57e   :  { %2479 = dma.done.wait [#allocation4], 16  }
 0x57f   :  { %2480 = vsyncadd [#allocation4], 4294967280 }
 0x580   :  { %2091 = vsyncpa [#allocation4], 1 }

</bundles_post_ra>
